<compile_context>
chip_gen: v7x
topology: tpu7x:2x2x1
jax: 0.10.0
libtpu: 0.0.40
codegen_flags: <defaults>
</compile_context>

<pallas_src>
import functools

import jax
import jax.numpy as jnp
from jax.experimental import pallas as pl
from jax.experimental.pallas import tpu as pltpu


# ------------------------------ fused kernel ---------------------------------

def _fused_residual_mlp_kernel(*refs, num_res_blocks, eps):
    """MaterialEmbedding(reduce=True) -> Linear/ReLU/LN -> ResidualLinear* -> Linear."""
    idx_ref, prop_ref, emb_ref, pw_ref, pb_ref = refs[:5]
    out_ref = refs[-1]
    params = list(refs[5:-1])

    def nxt():
        return params.pop(0)[...]

    idx = idx_ref[...]                       # (TB, M) int32
    prop = prop_ref[...]                     # (TB, M) f32
    emb = emb_ref[...]                       # (Vp, D) bf16, VMEM-resident
    tb, m_count = idx.shape
    vp = emb.shape[0]

    # ---- MaterialEmbedding (reduce=True), folded into a counts @ table matmul ----
    #   counts[b, v] = #{m : idx[b, m] == v}  ==>  sum_m emb[idx[b,m]] == counts @ emb
    vocab = jax.lax.broadcasted_iota(jnp.int32, (tb, vp), dimension=1)
    counts = jnp.zeros((tb, vp), dtype=jnp.float32)
    for m in range(m_count):                 # small static loop: 2-D VPU compare+add
        counts = counts + (vocab == idx[:, m:m + 1]).astype(jnp.float32)
    # counts are small integers -> exact in bf16; accumulate in f32 on the MXU.
    mat_emb = jnp.dot(counts.astype(emb.dtype), emb,
                      preferred_element_type=jnp.float32)            # (TB, D) f32

    # sum_m (prop[b,m] * w + b) == (sum_m prop[b,m]) * w + M * b   (VPU, f32)
    prop_sum = jnp.sum(prop, axis=1, keepdims=True)                  # (TB, 1)
    h = mat_emb + prop_sum * pw_ref[...] + float(m_count) * pb_ref[...]

    def dot_bf16(x_f32, w_bf16):
        return jnp.dot(x_f32.astype(jnp.bfloat16), w_bf16,
                       preferred_element_type=jnp.float32)

    def layer_norm(v, g, b):                 # f32 statistics
        mean = jnp.mean(v, axis=-1, keepdims=True)
        var = jnp.mean(jnp.square(v - mean), axis=-1, keepdims=True)
        return (v - mean) * jax.lax.rsqrt(var + eps) * g + b

    # input block: Linear -> ReLU -> LayerNorm
    w, b = nxt(), nxt()
    h = jnp.maximum(dot_bf16(h, w) + b, 0.0)
    g, be = nxt(), nxt()
    h = layer_norm(h, g, be)

    # ResidualLinear: Linear -> (dropout = identity in eval) -> ReLU -> LN -> x + y
    for _ in range(num_res_blocks):
        w, b = nxt(), nxt()
        y = jnp.maximum(dot_bf16(h, w) + b, 0.0)
        g, be = nxt(), nxt()
        y = layer_norm(y, g, be)
        h = h + y

    # final projection (weights lane-padded to a multiple of 128 output columns)
    w, b = nxt(), nxt()
    out_ref[...] = (dot_bf16(h, w) + b).astype(out_ref.dtype)


# -------------------------------- wrapper -------------------------------------

def residual_mlp_forward(x, params, *, tb=32, eps=1e-5):
    """Full ResidualMLP.forward (embedding=True, attention=False, norm='layer', eval).

    x: (B, M, 2) with [material_index, proportion] in the last dim.
    """
    B, M, _ = x.shape
    emb_table = params["emb_table"]
    V, D = emb_table.shape
    num_res_blocks = params["num_res_blocks"]
    out_features = params["out_features"]

    tb = min(tb, B)
    assert B % tb == 0, "batch must be divisible by the batch tile"
    assert tb % 8 == 0, "batch tile must be sublane-aligned"

    # Matches `x[..., 0].long()` (truncation, non-negative) and `x[..., 1].unsqueeze(-1)`.
    idx = x[..., 0].astype(jnp.int32)
    prop = x[..., 1].astype(jnp.float32)

    # Lane-align the counts contraction dim (padded rows are never indexed).
    vp = max(128, -(-V // 128) * 128)
    emb_p = jnp.zeros((vp, D), jnp.bfloat16).at[:V].set(emb_table.astype(jnp.bfloat16))

    pw = params["prop_w"].reshape(1, D).astype(jnp.float32)   # nn.Linear(1, D).weight -> (1, D)
    pb = params["prop_b"].reshape(1, D).astype(jnp.float32)

    # Resident MLP params: weights bf16, biases / LN affine f32, lane-padded output head.
    raw = list(params["mlp"])
    mlp = []
    for _ in range(1 + num_res_blocks):
        w, b, g, be = raw[:4]
        raw = raw[4:]
        mlp += [w.astype(jnp.bfloat16),
                b.reshape(1, -1).astype(jnp.float32),
                g.reshape(1, -1).astype(jnp.float32),
                be.reshape(1, -1).astype(jnp.float32)]
    wo, bo = raw
    h_last = wo.shape[0]
    out_pad = max(128, -(-out_features // 128) * 128)
    wo_p = jnp.zeros((h_last, out_pad), jnp.bfloat16).at[:, :out_features].set(
        wo.astype(jnp.bfloat16))
    bo_p = jnp.zeros((1, out_pad), jnp.float32).at[:, :out_features].set(
        bo.reshape(1, -1).astype(jnp.float32))
    mlp += [wo_p, bo_p]

    # Whole-array VMEM residents: copied once, single-buffered, no per-step re-DMA.
    resident = pl.BlockSpec(memory_space=pltpu.MemorySpace.VMEM)
    in_specs = [
        pl.BlockSpec((tb, M), lambda i: (i, 0)),   # idx   (batch tiled)
        pl.BlockSpec((tb, M), lambda i: (i, 0)),   # prop  (batch tiled)
        resident,                                  # embedding table (padded, bf16)
        resident,                                  # proportions weight
        resident,                                  # proportions bias
    ] + [resident] * len(mlp)

    matmul_flops = 2 * B * vp * D + sum(
        2 * B * p.shape[0] * p.shape[1] for p in mlp if p.ndim == 2 and p.shape[0] > 1)
    param_bytes = (emb_p.size * 2 + (pw.size + pb.size) * 4
                   + sum(int(p.size) * p.dtype.itemsize for p in mlp))
    bytes_accessed = 8 * B * M + param_bytes + 4 * B * out_pad
    cost = pl.CostEstimate(flops=matmul_flops + 2 * B * M * vp,
                           transcendentals=B * (1 + num_res_blocks),
                           bytes_accessed=int(bytes_accessed))

    kernel = functools.partial(_fused_residual_mlp_kernel,
                               num_res_blocks=num_res_blocks, eps=eps)

    out_padded = pl.pallas_call(
        kernel,
        out_shape=jax.ShapeDtypeStruct((B, out_pad), jnp.float32),
        grid=(B // tb,),
        in_specs=in_specs,
        out_specs=pl.BlockSpec((tb, out_pad), lambda i: (i, 0)),
        compiler_params=pltpu.CompilerParams(
            dimension_semantics=("parallel",),
            vmem_limit_bytes=48 * 1024 * 1024),   # explicit budget; fits v5e/v6e/v7x
        cost_estimate=cost,
    )(idx, prop, emb_p, pw, pb, *mlp)

    return out_padded[:, :out_features]


# ------------------------------- reference ------------------------------------

def _reference(x, params, eps=1e-5):
    dot = functools.partial(jnp.dot, precision=jax.lax.Precision.HIGHEST)
    idx = x[..., 0].astype(jnp.int32)
    prop = x[..., 1][..., None]
    mat_emb = params["emb_table"][idx]                                       # (B, M, D)
    prop_emb = prop * params["prop_w"].reshape(1, 1, -1) + params["prop_b"].reshape(1, 1, -1)
    h = (mat_emb + prop_emb).sum(axis=1)                                     # (B, D)

    def ln(v, g, b):
        m = v.mean(axis=-1, keepdims=True)
        var = jnp.square(v - m).mean(axis=-1, keepdims=True)
        return (v - m) / jnp.sqrt(var + eps) * g.reshape(1, -1) + b.reshape(1, -1)

    p = list(params["mlp"])
    w, b, g, be = p[:4]; p = p[4:]
    h = ln(jnp.maximum(dot(h, w) + b.reshape(1, -1), 0.0), g, be)
    for _ in range(params["num_res_blocks"]):
        w, b, g, be = p[:4]; p = p[4:]
        y = ln(jnp.maximum(dot(h, w) + b.reshape(1, -1), 0.0), g, be)
        h = h + y
    w, b = p[:2]
    return dot(h, w) + b.reshape(1, -1)


# ---------------------------------- demo ---------------------------------------

if __name__ == "__main__":
    B, M, V, D = 64, 16, 64, 128        # batch, materials/sample, vocab, embedding dim
    HIDDEN = [128, 128]                 # lane-aligned hidden widths (256-multiples ideal on v6e/v7x)
    OUT = 8
    TB = 32                             # bf16-sublane-aligned tile -> grid of 2 parallel steps

    key = jax.random.PRNGKey(0)
    ks = jax.random.split(key, 16)

    emb_table = 0.5 * jax.random.normal(ks[0], (V, D), dtype=jnp.float32)
    prop_w = 0.5 * jax.random.normal(ks[1], (D, 1), dtype=jnp.float32)   # nn.Linear(1, D).weight
    prop_b = 0.1 * jax.random.normal(ks[2], (D,), dtype=jnp.float32)

    def make_linear(k, fin, fout, scale):
        kw, kb = jax.random.split(k)
        w = jax.random.normal(kw, (fin, fout), dtype=jnp.float32) * scale   # stored as W.T
        b = jax.random.normal(kb, (1, fout), dtype=jnp.float32) * 0.05
        return w, b

    def make_ln(k, f):
        kg, kb = jax.random.split(k)
        g = 1.0 + 0.1 * jax.random.normal(kg, (1, f), dtype=jnp.float32)
        be = 0.05 * jax.random.normal(kb, (1, f), dtype=jnp.float32)
        return g, be

    mlp_params = []
    w0, b0 = make_linear(ks[3], D, HIDDEN[0], 0.05)
    g0, be0 = make_ln(ks[4], HIDDEN[0])
    mlp_params += [w0, b0, g0, be0]
    for li in range(1, len(HIDDEN)):
        w, b = make_linear(ks[4 + 2 * li], HIDDEN[li - 1], HIDDEN[li], 0.05)
        g, be = make_ln(ks[5 + 2 * li], HIDDEN[li])
        mlp_params += [w, b, g, be]
    wo, bo = make_linear(ks[10], HIDDEN[-1], OUT, 0.1)
    mlp_params += [wo, bo]

    params = dict(emb_table=emb_table, prop_w=prop_w, prop_b=prop_b,
                  mlp=mlp_params, num_res_blocks=len(HIDDEN) - 1, out_features=OUT)

    # Input: (B, M, 2) with [material_index, proportion] packed in the last dim.
    mat_indices = jax.random.randint(ks[11], (B, M), 0, V).astype(jnp.float32)
    proportions = jax.random.uniform(ks[12], (B, M), dtype=jnp.float32)
    x = jnp.stack([mat_indices, proportions], axis=-1)

    out = jax.block_until_ready(residual_mlp_forward(x, params, tb=TB))
    ref = _reference(x, params)
    assert out.shape == (B, OUT), out.shape
    # Loose tolerance: bf16 MXU operands (f32 accumulation) vs HIGHEST-precision f32 ref.
    assert jnp.allclose(out, ref, atol=1e-1, rtol=1e-1), (
        f"mismatch vs reference, max abs diff {jnp.max(jnp.abs(out - ref))}")

    print("KERNEL_OK")
</pallas_src>

<mosaic_0001>
module attributes {stable_mosaic.version = 11 : i64} {
  func.func @_fused_residual_mlp_kernel(%arg0: i32, %arg1: memref<32x16xi32, #tpu.memory_space<vmem>>, %arg2: memref<32x16xf32, #tpu.memory_space<vmem>>, %arg3: memref<128x128xbf16, #tpu.memory_space<vmem>>, %arg4: memref<1x128xf32, #tpu.memory_space<vmem>>, %arg5: memref<1x128xf32, #tpu.memory_space<vmem>>, %arg6: memref<128x128xbf16, #tpu.memory_space<vmem>>, %arg7: memref<1x128xf32, #tpu.memory_space<vmem>>, %arg8: memref<1x128xf32, #tpu.memory_space<vmem>>, %arg9: memref<1x128xf32, #tpu.memory_space<vmem>>, %arg10: memref<128x128xbf16, #tpu.memory_space<vmem>>, %arg11: memref<1x128xf32, #tpu.memory_space<vmem>>, %arg12: memref<1x128xf32, #tpu.memory_space<vmem>>, %arg13: memref<1x128xf32, #tpu.memory_space<vmem>>, %arg14: memref<128x128xbf16, #tpu.memory_space<vmem>>, %arg15: memref<1x128xf32, #tpu.memory_space<vmem>>, %arg16: memref<32x128xf32, #tpu.memory_space<vmem>>) attributes {dimension_semantics = [#tpu.dimension_semantics<parallel>], iteration_bounds = array<i64: 2>, scalar_prefetch = 0 : i64, scratch_operands = 0 : i64, tpu.core_type = #tpu.core_type<tc>, window_params = [{transform_indices = @transform_0, window_bounds = array<i64: 32, 16>}, {transform_indices = @transform_1, window_bounds = array<i64: 32, 16>}, {pipeline_mode = #tpu.pipeline_mode<synchronous>, transform_indices = @transform_2, window_bounds = array<i64: 128, 128>}, {pipeline_mode = #tpu.pipeline_mode<synchronous>, transform_indices = @transform_3, window_bounds = array<i64: 1, 128>}, {pipeline_mode = #tpu.pipeline_mode<synchronous>, transform_indices = @transform_4, window_bounds = array<i64: 1, 128>}, {pipeline_mode = #tpu.pipeline_mode<synchronous>, transform_indices = @transform_5, window_bounds = array<i64: 128, 128>}, {pipeline_mode = #tpu.pipeline_mode<synchronous>, transform_indices = @transform_6, window_bounds = array<i64: 1, 128>}, {pipeline_mode = #tpu.pipeline_mode<synchronous>, transform_indices = @transform_7, window_bounds = array<i64: 1, 128>}, {pipeline_mode = #tpu.pipeline_mode<synchronous>, transform_indices = @transform_8, window_bounds = array<i64: 1, 128>}, {pipeline_mode = #tpu.pipeline_mode<synchronous>, transform_indices = @transform_9, window_bounds = array<i64: 128, 128>}, {pipeline_mode = #tpu.pipeline_mode<synchronous>, transform_indices = @transform_10, window_bounds = array<i64: 1, 128>}, {pipeline_mode = #tpu.pipeline_mode<synchronous>, transform_indices = @transform_11, window_bounds = array<i64: 1, 128>}, {pipeline_mode = #tpu.pipeline_mode<synchronous>, transform_indices = @transform_12, window_bounds = array<i64: 1, 128>}, {pipeline_mode = #tpu.pipeline_mode<synchronous>, transform_indices = @transform_13, window_bounds = array<i64: 128, 128>}, {pipeline_mode = #tpu.pipeline_mode<synchronous>, transform_indices = @transform_14, window_bounds = array<i64: 1, 128>}, {transform_indices = @transform_15, window_bounds = array<i64: 32, 128>}]} {
    %c0 = arith.constant 0 : index
    %c0_0 = arith.constant 0 : index
    %0 = vector.load %arg1[%c0, %c0_0] : memref<32x16xi32, #tpu.memory_space<vmem>>, vector<32x16xi32>
    %c0_1 = arith.constant 0 : index
    %c0_2 = arith.constant 0 : index
    %1 = vector.load %arg2[%c0_1, %c0_2] : memref<32x16xf32, #tpu.memory_space<vmem>>, vector<32x16xf32>
    %c0_3 = arith.constant 0 : index
    %c0_4 = arith.constant 0 : index
    %2 = vector.load %arg3[%c0_3, %c0_4] : memref<128x128xbf16, #tpu.memory_space<vmem>>, vector<128x128xbf16>
    %3 = tpu.iota {dimensions = array<i32: 1>} : vector<32x128xi32>
    %cst = arith.constant 0.000000e+00 : f32
    %4 = vector.broadcast %cst : f32 to vector<32x128xf32>
    %5 = vector.extract_strided_slice %0 {offsets = [0, 0], sizes = [32, 1], strides = [1, 1]} : vector<32x16xi32> to vector<32x1xi32>
    %6 = vector.broadcast %5 : vector<32x1xi32> to vector<32x128xi32>
    %7 = arith.cmpi eq, %3, %6 : vector<32x128xi32>
    %8 = arith.extui %7 : vector<32x128xi1> to vector<32x128xi32>
    %9 = arith.sitofp %8 : vector<32x128xi32> to vector<32x128xf32>
    %10 = arith.addf %4, %9 : vector<32x128xf32>
    %11 = vector.extract_strided_slice %0 {offsets = [0, 1], sizes = [32, 1], strides = [1, 1]} : vector<32x16xi32> to vector<32x1xi32>
    %12 = vector.broadcast %11 : vector<32x1xi32> to vector<32x128xi32>
    %13 = arith.cmpi eq, %3, %12 : vector<32x128xi32>
    %14 = arith.extui %13 : vector<32x128xi1> to vector<32x128xi32>
    %15 = arith.sitofp %14 : vector<32x128xi32> to vector<32x128xf32>
    %16 = arith.addf %10, %15 : vector<32x128xf32>
    %17 = vector.extract_strided_slice %0 {offsets = [0, 2], sizes = [32, 1], strides = [1, 1]} : vector<32x16xi32> to vector<32x1xi32>
    %18 = vector.broadcast %17 : vector<32x1xi32> to vector<32x128xi32>
    %19 = arith.cmpi eq, %3, %18 : vector<32x128xi32>
    %20 = arith.extui %19 : vector<32x128xi1> to vector<32x128xi32>
    %21 = arith.sitofp %20 : vector<32x128xi32> to vector<32x128xf32>
    %22 = arith.addf %16, %21 : vector<32x128xf32>
    %23 = vector.extract_strided_slice %0 {offsets = [0, 3], sizes = [32, 1], strides = [1, 1]} : vector<32x16xi32> to vector<32x1xi32>
    %24 = vector.broadcast %23 : vector<32x1xi32> to vector<32x128xi32>
    %25 = arith.cmpi eq, %3, %24 : vector<32x128xi32>
    %26 = arith.extui %25 : vector<32x128xi1> to vector<32x128xi32>
    %27 = arith.sitofp %26 : vector<32x128xi32> to vector<32x128xf32>
    %28 = arith.addf %22, %27 : vector<32x128xf32>
    %29 = vector.extract_strided_slice %0 {offsets = [0, 4], sizes = [32, 1], strides = [1, 1]} : vector<32x16xi32> to vector<32x1xi32>
    %30 = vector.broadcast %29 : vector<32x1xi32> to vector<32x128xi32>
    %31 = arith.cmpi eq, %3, %30 : vector<32x128xi32>
    %32 = arith.extui %31 : vector<32x128xi1> to vector<32x128xi32>
    %33 = arith.sitofp %32 : vector<32x128xi32> to vector<32x128xf32>
    %34 = arith.addf %28, %33 : vector<32x128xf32>
    %35 = vector.extract_strided_slice %0 {offsets = [0, 5], sizes = [32, 1], strides = [1, 1]} : vector<32x16xi32> to vector<32x1xi32>
    %36 = vector.broadcast %35 : vector<32x1xi32> to vector<32x128xi32>
    %37 = arith.cmpi eq, %3, %36 : vector<32x128xi32>
    %38 = arith.extui %37 : vector<32x128xi1> to vector<32x128xi32>
    %39 = arith.sitofp %38 : vector<32x128xi32> to vector<32x128xf32>
    %40 = arith.addf %34, %39 : vector<32x128xf32>
    %41 = vector.extract_strided_slice %0 {offsets = [0, 6], sizes = [32, 1], strides = [1, 1]} : vector<32x16xi32> to vector<32x1xi32>
    %42 = vector.broadcast %41 : vector<32x1xi32> to vector<32x128xi32>
    %43 = arith.cmpi eq, %3, %42 : vector<32x128xi32>
    %44 = arith.extui %43 : vector<32x128xi1> to vector<32x128xi32>
    %45 = arith.sitofp %44 : vector<32x128xi32> to vector<32x128xf32>
    %46 = arith.addf %40, %45 : vector<32x128xf32>
    %47 = vector.extract_strided_slice %0 {offsets = [0, 7], sizes = [32, 1], strides = [1, 1]} : vector<32x16xi32> to vector<32x1xi32>
    %48 = vector.broadcast %47 : vector<32x1xi32> to vector<32x128xi32>
    %49 = arith.cmpi eq, %3, %48 : vector<32x128xi32>
    %50 = arith.extui %49 : vector<32x128xi1> to vector<32x128xi32>
    %51 = arith.sitofp %50 : vector<32x128xi32> to vector<32x128xf32>
    %52 = arith.addf %46, %51 : vector<32x128xf32>
    %53 = vector.extract_strided_slice %0 {offsets = [0, 8], sizes = [32, 1], strides = [1, 1]} : vector<32x16xi32> to vector<32x1xi32>
    %54 = vector.broadcast %53 : vector<32x1xi32> to vector<32x128xi32>
    %55 = arith.cmpi eq, %3, %54 : vector<32x128xi32>
    %56 = arith.extui %55 : vector<32x128xi1> to vector<32x128xi32>
    %57 = arith.sitofp %56 : vector<32x128xi32> to vector<32x128xf32>
    %58 = arith.addf %52, %57 : vector<32x128xf32>
    %59 = vector.extract_strided_slice %0 {offsets = [0, 9], sizes = [32, 1], strides = [1, 1]} : vector<32x16xi32> to vector<32x1xi32>
    %60 = vector.broadcast %59 : vector<32x1xi32> to vector<32x128xi32>
    %61 = arith.cmpi eq, %3, %60 : vector<32x128xi32>
    %62 = arith.extui %61 : vector<32x128xi1> to vector<32x128xi32>
    %63 = arith.sitofp %62 : vector<32x128xi32> to vector<32x128xf32>
    %64 = arith.addf %58, %63 : vector<32x128xf32>
    %65 = vector.extract_strided_slice %0 {offsets = [0, 10], sizes = [32, 1], strides = [1, 1]} : vector<32x16xi32> to vector<32x1xi32>
    %66 = vector.broadcast %65 : vector<32x1xi32> to vector<32x128xi32>
    %67 = arith.cmpi eq, %3, %66 : vector<32x128xi32>
    %68 = arith.extui %67 : vector<32x128xi1> to vector<32x128xi32>
    %69 = arith.sitofp %68 : vector<32x128xi32> to vector<32x128xf32>
    %70 = arith.addf %64, %69 : vector<32x128xf32>
    %71 = vector.extract_strided_slice %0 {offsets = [0, 11], sizes = [32, 1], strides = [1, 1]} : vector<32x16xi32> to vector<32x1xi32>
    %72 = vector.broadcast %71 : vector<32x1xi32> to vector<32x128xi32>
    %73 = arith.cmpi eq, %3, %72 : vector<32x128xi32>
    %74 = arith.extui %73 : vector<32x128xi1> to vector<32x128xi32>
    %75 = arith.sitofp %74 : vector<32x128xi32> to vector<32x128xf32>
    %76 = arith.addf %70, %75 : vector<32x128xf32>
    %77 = vector.extract_strided_slice %0 {offsets = [0, 12], sizes = [32, 1], strides = [1, 1]} : vector<32x16xi32> to vector<32x1xi32>
    %78 = vector.broadcast %77 : vector<32x1xi32> to vector<32x128xi32>
    %79 = arith.cmpi eq, %3, %78 : vector<32x128xi32>
    %80 = arith.extui %79 : vector<32x128xi1> to vector<32x128xi32>
    %81 = arith.sitofp %80 : vector<32x128xi32> to vector<32x128xf32>
    %82 = arith.addf %76, %81 : vector<32x128xf32>
    %83 = vector.extract_strided_slice %0 {offsets = [0, 13], sizes = [32, 1], strides = [1, 1]} : vector<32x16xi32> to vector<32x1xi32>
    %84 = vector.broadcast %83 : vector<32x1xi32> to vector<32x128xi32>
    %85 = arith.cmpi eq, %3, %84 : vector<32x128xi32>
    %86 = arith.extui %85 : vector<32x128xi1> to vector<32x128xi32>
    %87 = arith.sitofp %86 : vector<32x128xi32> to vector<32x128xf32>
    %88 = arith.addf %82, %87 : vector<32x128xf32>
    %89 = vector.extract_strided_slice %0 {offsets = [0, 14], sizes = [32, 1], strides = [1, 1]} : vector<32x16xi32> to vector<32x1xi32>
    %90 = vector.broadcast %89 : vector<32x1xi32> to vector<32x128xi32>
    %91 = arith.cmpi eq, %3, %90 : vector<32x128xi32>
    %92 = arith.extui %91 : vector<32x128xi1> to vector<32x128xi32>
    %93 = arith.sitofp %92 : vector<32x128xi32> to vector<32x128xf32>
    %94 = arith.addf %88, %93 : vector<32x128xf32>
    %95 = vector.extract_strided_slice %0 {offsets = [0, 15], sizes = [32, 1], strides = [1, 1]} : vector<32x16xi32> to vector<32x1xi32>
    %96 = vector.broadcast %95 : vector<32x1xi32> to vector<32x128xi32>
    %97 = arith.cmpi eq, %3, %96 : vector<32x128xi32>
    %98 = arith.extui %97 : vector<32x128xi1> to vector<32x128xi32>
    %99 = arith.sitofp %98 : vector<32x128xi32> to vector<32x128xf32>
    %100 = arith.addf %94, %99 : vector<32x128xf32>
    %101 = arith.truncf %100 : vector<32x128xf32> to vector<32x128xbf16>
    %cst_5 = arith.constant dense<0.000000e+00> : vector<32x128xf32>
    %102 = tpu.matmul %101, %2, %cst_5 {dimension_numbers = #tpu.dot_dimension_numbers<[1], [0], [0], [1], [0, 0, 1, 1], [], []>} : vector<32x128xbf16>, vector<128x128xbf16>, vector<32x128xf32> -> vector<32x128xf32>
    %cst_6 = arith.constant dense<0.000000e+00> : vector<32xf32>
    %103 = vector.multi_reduction <add>, %1, %cst_6 [1] : vector<32x16xf32> to vector<32xf32>
    %104 = vector.shape_cast %103 : vector<32xf32> to vector<32x1xf32>
    %c0_7 = arith.constant 0 : index
    %c0_8 = arith.constant 0 : index
    %105 = vector.load %arg4[%c0_7, %c0_8] : memref<1x128xf32, #tpu.memory_space<vmem>>, vector<1x128xf32>
    %106 = vector.broadcast %104 : vector<32x1xf32> to vector<32x128xf32>
    %107 = vector.broadcast %105 : vector<1x128xf32> to vector<32x128xf32>
    %108 = arith.mulf %106, %107 : vector<32x128xf32>
    %109 = arith.addf %102, %108 : vector<32x128xf32>
    %c0_9 = arith.constant 0 : index
    %c0_10 = arith.constant 0 : index
    %110 = vector.load %arg5[%c0_9, %c0_10] : memref<1x128xf32, #tpu.memory_space<vmem>>, vector<1x128xf32>
    %cst_11 = arith.constant 1.600000e+01 : f32
    %111 = vector.broadcast %cst_11 : f32 to vector<1x128xf32>
    %112 = arith.mulf %111, %110 : vector<1x128xf32>
    %113 = vector.broadcast %112 : vector<1x128xf32> to vector<32x128xf32>
    %114 = arith.addf %109, %113 : vector<32x128xf32>
    %c0_12 = arith.constant 0 : index
    %c0_13 = arith.constant 0 : index
    %115 = vector.load %arg6[%c0_12, %c0_13] : memref<128x128xbf16, #tpu.memory_space<vmem>>, vector<128x128xbf16>
    %c0_14 = arith.constant 0 : index
    %c0_15 = arith.constant 0 : index
    %116 = vector.load %arg7[%c0_14, %c0_15] : memref<1x128xf32, #tpu.memory_space<vmem>>, vector<1x128xf32>
    %117 = arith.truncf %114 : vector<32x128xf32> to vector<32x128xbf16>
    %cst_16 = arith.constant dense<0.000000e+00> : vector<32x128xf32>
    %118 = tpu.matmul %117, %115, %cst_16 {dimension_numbers = #tpu.dot_dimension_numbers<[1], [0], [0], [1], [0, 0, 1, 1], [], []>} : vector<32x128xbf16>, vector<128x128xbf16>, vector<32x128xf32> -> vector<32x128xf32>
    %119 = vector.broadcast %116 : vector<1x128xf32> to vector<32x128xf32>
    %120 = arith.addf %118, %119 : vector<32x128xf32>
    %cst_17 = arith.constant 0.000000e+00 : f32
    %121 = vector.broadcast %cst_17 : f32 to vector<32x128xf32>
    %122 = arith.maximumf %120, %121 : vector<32x128xf32>
    %c0_18 = arith.constant 0 : index
    %c0_19 = arith.constant 0 : index
    %123 = vector.load %arg8[%c0_18, %c0_19] : memref<1x128xf32, #tpu.memory_space<vmem>>, vector<1x128xf32>
    %c0_20 = arith.constant 0 : index
    %c0_21 = arith.constant 0 : index
    %124 = vector.load %arg9[%c0_20, %c0_21] : memref<1x128xf32, #tpu.memory_space<vmem>>, vector<1x128xf32>
    %cst_22 = arith.constant dense<0.000000e+00> : vector<32xf32>
    %125 = vector.multi_reduction <add>, %122, %cst_22 [1] : vector<32x128xf32> to vector<32xf32>
    %126 = vector.shape_cast %125 : vector<32xf32> to vector<32x1xf32>
    %cst_23 = arith.constant 1.280000e+02 : f32
    %127 = vector.broadcast %cst_23 : f32 to vector<32x1xf32>
    %128 = arith.divf %126, %127 : vector<32x1xf32>
    %129 = vector.broadcast %128 : vector<32x1xf32> to vector<32x128xf32>
    %130 = arith.subf %122, %129 : vector<32x128xf32>
    %131 = arith.mulf %130, %130 : vector<32x128xf32>
    %cst_24 = arith.constant dense<0.000000e+00> : vector<32xf32>
    %132 = vector.multi_reduction <add>, %131, %cst_24 [1] : vector<32x128xf32> to vector<32xf32>
    %133 = vector.shape_cast %132 : vector<32xf32> to vector<32x1xf32>
    %cst_25 = arith.constant 1.280000e+02 : f32
    %134 = vector.broadcast %cst_25 : f32 to vector<32x1xf32>
    %135 = arith.divf %133, %134 : vector<32x1xf32>
    %136 = vector.broadcast %128 : vector<32x1xf32> to vector<32x128xf32>
    %137 = arith.subf %122, %136 : vector<32x128xf32>
    %cst_26 = arith.constant 9.99999974E-6 : f32
    %138 = vector.broadcast %cst_26 : f32 to vector<32x1xf32>
    %139 = arith.addf %135, %138 : vector<32x1xf32>
    %140 = math.rsqrt %139 : vector<32x1xf32>
    %141 = vector.broadcast %140 : vector<32x1xf32> to vector<32x128xf32>
    %142 = arith.mulf %137, %141 : vector<32x128xf32>
    %143 = vector.broadcast %123 : vector<1x128xf32> to vector<32x128xf32>
    %144 = arith.mulf %142, %143 : vector<32x128xf32>
    %145 = vector.broadcast %124 : vector<1x128xf32> to vector<32x128xf32>
    %146 = arith.addf %144, %145 : vector<32x128xf32>
    %c0_27 = arith.constant 0 : index
    %c0_28 = arith.constant 0 : index
    %147 = vector.load %arg10[%c0_27, %c0_28] : memref<128x128xbf16, #tpu.memory_space<vmem>>, vector<128x128xbf16>
    %c0_29 = arith.constant 0 : index
    %c0_30 = arith.constant 0 : index
    %148 = vector.load %arg11[%c0_29, %c0_30] : memref<1x128xf32, #tpu.memory_space<vmem>>, vector<1x128xf32>
    %149 = arith.truncf %146 : vector<32x128xf32> to vector<32x128xbf16>
    %cst_31 = arith.constant dense<0.000000e+00> : vector<32x128xf32>
    %150 = tpu.matmul %149, %147, %cst_31 {dimension_numbers = #tpu.dot_dimension_numbers<[1], [0], [0], [1], [0, 0, 1, 1], [], []>} : vector<32x128xbf16>, vector<128x128xbf16>, vector<32x128xf32> -> vector<32x128xf32>
    %151 = vector.broadcast %148 : vector<1x128xf32> to vector<32x128xf32>
    %152 = arith.addf %150, %151 : vector<32x128xf32>
    %cst_32 = arith.constant 0.000000e+00 : f32
    %153 = vector.broadcast %cst_32 : f32 to vector<32x128xf32>
    %154 = arith.maximumf %152, %153 : vector<32x128xf32>
    %c0_33 = arith.constant 0 : index
    %c0_34 = arith.constant 0 : index
    %155 = vector.load %arg12[%c0_33, %c0_34] : memref<1x128xf32, #tpu.memory_space<vmem>>, vector<1x128xf32>
    %c0_35 = arith.constant 0 : index
    %c0_36 = arith.constant 0 : index
    %156 = vector.load %arg13[%c0_35, %c0_36] : memref<1x128xf32, #tpu.memory_space<vmem>>, vector<1x128xf32>
    %cst_37 = arith.constant dense<0.000000e+00> : vector<32xf32>
    %157 = vector.multi_reduction <add>, %154, %cst_37 [1] : vector<32x128xf32> to vector<32xf32>
    %158 = vector.shape_cast %157 : vector<32xf32> to vector<32x1xf32>
    %cst_38 = arith.constant 1.280000e+02 : f32
    %159 = vector.broadcast %cst_38 : f32 to vector<32x1xf32>
    %160 = arith.divf %158, %159 : vector<32x1xf32>
    %161 = vector.broadcast %160 : vector<32x1xf32> to vector<32x128xf32>
    %162 = arith.subf %154, %161 : vector<32x128xf32>
    %163 = arith.mulf %162, %162 : vector<32x128xf32>
    %cst_39 = arith.constant dense<0.000000e+00> : vector<32xf32>
    %164 = vector.multi_reduction <add>, %163, %cst_39 [1] : vector<32x128xf32> to vector<32xf32>
    %165 = vector.shape_cast %164 : vector<32xf32> to vector<32x1xf32>
    %cst_40 = arith.constant 1.280000e+02 : f32
    %166 = vector.broadcast %cst_40 : f32 to vector<32x1xf32>
    %167 = arith.divf %165, %166 : vector<32x1xf32>
    %168 = vector.broadcast %160 : vector<32x1xf32> to vector<32x128xf32>
    %169 = arith.subf %154, %168 : vector<32x128xf32>
    %cst_41 = arith.constant 9.99999974E-6 : f32
    %170 = vector.broadcast %cst_41 : f32 to vector<32x1xf32>
    %171 = arith.addf %167, %170 : vector<32x1xf32>
    %172 = math.rsqrt %171 : vector<32x1xf32>
    %173 = vector.broadcast %172 : vector<32x1xf32> to vector<32x128xf32>
    %174 = arith.mulf %169, %173 : vector<32x128xf32>
    %175 = vector.broadcast %155 : vector<1x128xf32> to vector<32x128xf32>
    %176 = arith.mulf %174, %175 : vector<32x128xf32>
    %177 = vector.broadcast %156 : vector<1x128xf32> to vector<32x128xf32>
    %178 = arith.addf %176, %177 : vector<32x128xf32>
    %179 = arith.addf %146, %178 : vector<32x128xf32>
    %c0_42 = arith.constant 0 : index
    %c0_43 = arith.constant 0 : index
    %180 = vector.load %arg14[%c0_42, %c0_43] : memref<128x128xbf16, #tpu.memory_space<vmem>>, vector<128x128xbf16>
    %c0_44 = arith.constant 0 : index
    %c0_45 = arith.constant 0 : index
    %181 = vector.load %arg15[%c0_44, %c0_45] : memref<1x128xf32, #tpu.memory_space<vmem>>, vector<1x128xf32>
    %182 = arith.truncf %179 : vector<32x128xf32> to vector<32x128xbf16>
    %cst_46 = arith.constant dense<0.000000e+00> : vector<32x128xf32>
    %183 = tpu.matmul %182, %180, %cst_46 {dimension_numbers = #tpu.dot_dimension_numbers<[1], [0], [0], [1], [0, 0, 1, 1], [], []>} : vector<32x128xbf16>, vector<128x128xbf16>, vector<32x128xf32> -> vector<32x128xf32>
    %184 = vector.broadcast %181 : vector<1x128xf32> to vector<32x128xf32>
    %185 = arith.addf %183, %184 : vector<32x128xf32>
    %c0_47 = arith.constant 0 : index
    %c0_48 = arith.constant 0 : index
    %186 = vector.load %arg16[%c0_47, %c0_48] : memref<32x128xf32, #tpu.memory_space<vmem>>, vector<32x128xf32>
    tpu.vector_store %arg16[%c0_47, %c0_48], %185 {strides = array<i32>} : memref<32x128xf32, #tpu.memory_space<vmem>>, vector<32x128xf32>,
    return
  }
  func.func @transform_0(%arg0: i32) -> (i32, i32) {
    %c0_i32 = arith.constant 0 : i32
    %c0_i32_0 = arith.constant 0 : i32
    return %arg0, %c0_i32 : i32, i32
  }
  func.func @transform_1(%arg0: i32) -> (i32, i32) {
    %c0_i32 = arith.constant 0 : i32
    %c0_i32_0 = arith.constant 0 : i32
    return %arg0, %c0_i32 : i32, i32
  }
  func.func @transform_2(%arg0: i32) -> (i32, i32) {
    %c0_i32 = arith.constant 0 : i32
    %c0_i32_0 = arith.constant 0 : i32
    %c0_i32_1 = arith.constant 0 : i32
    return %c0_i32, %c0_i32_0 : i32, i32
  }
  func.func @transform_3(%arg0: i32) -> (i32, i32) {
    %c0_i32 = arith.constant 0 : i32
    %c0_i32_0 = arith.constant 0 : i32
    %c0_i32_1 = arith.constant 0 : i32
    return %c0_i32, %c0_i32_0 : i32, i32
  }
  func.func @transform_4(%arg0: i32) -> (i32, i32) {
    %c0_i32 = arith.constant 0 : i32
    %c0_i32_0 = arith.constant 0 : i32
    %c0_i32_1 = arith.constant 0 : i32
    return %c0_i32, %c0_i32_0 : i32, i32
  }
  func.func @transform_5(%arg0: i32) -> (i32, i32) {
    %c0_i32 = arith.constant 0 : i32
    %c0_i32_0 = arith.constant 0 : i32
    %c0_i32_1 = arith.constant 0 : i32
    return %c0_i32, %c0_i32_0 : i32, i32
  }
  func.func @transform_6(%arg0: i32) -> (i32, i32) {
    %c0_i32 = arith.constant 0 : i32
    %c0_i32_0 = arith.constant 0 : i32
    %c0_i32_1 = arith.constant 0 : i32
    return %c0_i32, %c0_i32_0 : i32, i32
  }
  func.func @transform_7(%arg0: i32) -> (i32, i32) {
    %c0_i32 = arith.constant 0 : i32
    %c0_i32_0 = arith.constant 0 : i32
    %c0_i32_1 = arith.constant 0 : i32
    return %c0_i32, %c0_i32_0 : i32, i32
  }
  func.func @transform_8(%arg0: i32) -> (i32, i32) {
    %c0_i32 = arith.constant 0 : i32
    %c0_i32_0 = arith.constant 0 : i32
    %c0_i32_1 = arith.constant 0 : i32
    return %c0_i32, %c0_i32_0 : i32, i32
  }
  func.func @transform_9(%arg0: i32) -> (i32, i32) {
    %c0_i32 = arith.constant 0 : i32
    %c0_i32_0 = arith.constant 0 : i32
    %c0_i32_1 = arith.constant 0 : i32
    return %c0_i32, %c0_i32_0 : i32, i32
  }
  func.func @transform_10(%arg0: i32) -> (i32, i32) {
    %c0_i32 = arith.constant 0 : i32
    %c0_i32_0 = arith.constant 0 : i32
    %c0_i32_1 = arith.constant 0 : i32
    return %c0_i32, %c0_i32_0 : i32, i32
  }
  func.func @transform_11(%arg0: i32) -> (i32, i32) {
    %c0_i32 = arith.constant 0 : i32
    %c0_i32_0 = arith.constant 0 : i32
    %c0_i32_1 = arith.constant 0 : i32
    return %c0_i32, %c0_i32_0 : i32, i32
  }
  func.func @transform_12(%arg0: i32) -> (i32, i32) {
    %c0_i32 = arith.constant 0 : i32
    %c0_i32_0 = arith.constant 0 : i32
    %c0_i32_1 = arith.constant 0 : i32
    return %c0_i32, %c0_i32_0 : i32, i32
  }
  func.func @transform_13(%arg0: i32) -> (i32, i32) {
    %c0_i32 = arith.constant 0 : i32
    %c0_i32_0 = arith.constant 0 : i32
    %c0_i32_1 = arith.constant 0 : i32
    return %c0_i32, %c0_i32_0 : i32, i32
  }
  func.func @transform_14(%arg0: i32) -> (i32, i32) {
    %c0_i32 = arith.constant 0 : i32
    %c0_i32_0 = arith.constant 0 : i32
    %c0_i32_1 = arith.constant 0 : i32
    return %c0_i32, %c0_i32_0 : i32, i32
  }
  func.func @transform_15(%arg0: i32) -> (i32, i32) {
    %c0_i32 = arith.constant 0 : i32
    %c0_i32_0 = arith.constant 0 : i32
    return %arg0, %c0_i32 : i32, i32
  }
}

</mosaic_0001>

<bundles_post_ra>
// kernel: tpu_custom_call.1
= control target key start
LH: loop header
LB: loop body
LE: loop exit
PB: predicated region body
PF: predicated region fallthrough
CT: control target
= control target key end

     0   :  { %s3139_s0 = inlined_call_operand.vmem [shape: s32[64,16], index: 0, kind: input, shape index: {}]   ;;  %s3140_s1 = inlined_call_operand.vmem [shape: f32[64,16], index: 1, kind: input, shape index: {}]   ;;  %s3141_s2 = inlined_call_operand.vmem [shape: bf16[128,128], index: 2, kind: input, shape index: {}]   ;;  %s3142_s3 = inlined_call_operand.vmem [shape: f32[1,128], index: 3, kind: input, shape index: {}]   ;;  %s3143_s4 = inlined_call_operand.vmem [shape: f32[1,128], index: 4, kind: input, shape index: {}]   ;;  %s3144_s5 = inlined_call_operand.vmem [shape: bf16[128,128], index: 5, kind: input, shape index: {}]   ;;  %s3145_s6 = inlined_call_operand.hbm [shape: f32[1,128], index: 6, kind: input, shape index: {}]   ;;  %s3146_s7 = inlined_call_operand.hbm [shape: f32[1,128], index: 7, kind: input, shape index: {}]   ;;  %s3147_s8 = inlined_call_operand.hbm [shape: f32[1,128], index: 8, kind: input, shape index: {}]   ;;  %s3148_s9 = inlined_call_operand.vmem [shape: bf16[128,128], index: 9, kind: input, shape index: {}]   ;;  %s3149_s10 = inlined_call_operand.vmem [shape: f32[1,128], index: 10, kind: input, shape index: {}]   ;;  %s3150_s11 = inlined_call_operand.vmem [shape: f32[1,128], index: 11, kind: input, shape index: {}]   ;;  %s3151_s12 = inlined_call_operand.vmem [shape: f32[1,128], index: 12, kind: input, shape index: {}]   ;;  %s3152_s13 = inlined_call_operand.hbm [shape: bf16[128,128], index: 13, kind: input, shape index: {}]   ;;  %s3153_s14 = inlined_call_operand.vmem [shape: f32[1,128], index: 14, kind: input, shape index: {}]   ;;  %s3154_s15 = inlined_call_operand.hbm [shape: f32[64,128], index: 15, kind: output, shape index: {}]  }
   0x1   :  { %3167 = sst [smem:[#allocation22_spill]] %s3153_s14 }
   0x2   :  { %3168 = sst [smem:[#allocation23_spill]] %s3154_s15 }
   0x3   :  { %20 = vsyncpa [#allocation3], 0 }
   0x4   :  { %21 = vsyncpa [#allocation6], 0 }
   0x5   :  { %22 = vsyncpa [#allocation9], 0 }
   0x6   :  { %23 = vsyncpa [#allocation4], 0 }
   0x7   :  { %25 = vsyncpa [#allocation4 + $0x1], 0  ;;  %s2548_s18 = smov 0   ;;  %s2550_s19 = smov 0  }
   0x8   :  { %s2552_s20 = smov 0   ;;  %s2554_s21 = smov 0  }
   0x9 LB: > { %3169 = sst [smem:[#allocation15_spill]] %s2428_s18  ;;  %s2569_s22 = sadd.s32 4294967295, %s2440_s21   ;;  %s2440_s21 = sphi %s2554_s21, %s3196_s21   ;;  %s2436_s20 = sphi %s2552_s20, %s3198_s20   ;;  %s2432_s19 = sphi %s2550_s19, %s3200_s19   ;;  %s2428_s18 = sphi %s2548_s18, %s3199_s18  }
   0xa   : > { %3170 = sst [smem:[#allocation16_spill]] %s2436_s20  ;;  %s1825_s23 = sadd.s32 4294967294, %s2440_s21  }
   0xb   : > { %3171 = sst [smem:[#allocation17_spill]] %s2440_s21  ;;  %s2573_s24 = sadd.s32 1, %s2440_s21  }
   0xc   : > { %3172 = sst [smem:[#allocation18_spill]] %s2573_s24  ;;  %s363_s25 = sadd.s32 1, %s2436_s20 }
   0xd   : > { %s360_s26 = ssub.s32 %s2440_s21, %s2573_s24  ;;  %p373_p0 = scmp.ne.s32.totalorder %s2436_s20, %s2432_s19 }
   0xe   : > { %p361_p1 = scmp.eq.s32.totalorder %s360_s26, 0  ;;  %p374_p2 = scmp.eq.s32.totalorder %s2569_s22, 1 }
   0xf   : > { %p379_p3 = scmp.ne.s32.totalorder %s2432_s19, %s2428_s18  ;;  %p380_p4 = scmp.eq.s32.totalorder %s1825_s23, 1 }
  0x10   : > { %s2584_s27 = scalar_select %p361_p1, %s2436_s20, %s363_s25  }
  0x11   : > { %p2586_p5 = por %p374_p2, %p373_p0  ;;  %p2590_p6 = por %p380_p4, %p379_p3 }
  0x12   : > { %3173 = sst [smem:[#allocation19_spill]] %s2584_s27  ;;  %p1826_p7 = scmp.ge.s32.totalorder %s2440_s21, 1 }
  0x13   : > { %s3174_s28 = scalar_select %p2586_p5, 1, 0 }
  0x14   : > { %s3176_s29 = scalar_select %p2590_p6, 1, 0 }
  0x15   : > { %3175 = sst [smem:[#allocation20_spill]] %s3174_s28  ;;  %p387_p8 = scmp.lt.s32.totalorder %s2440_s21, 3 }
  0x16   : > { %3177 = sst [smem:[#allocation21_spill]] %s3176_s29  ;;  %p3162_p9 = scmp.eq.s32.totalorder %s2569_s22, 0 }
  0x17   : > { %p2597_p10 = pnand %p1826_p7, %p387_p8  ;;  %s2442_s16 = smov [#allocation5]  }
  0x18   : > { %s423_s17 = sshll.u32 %s2442_s16, 4  ;;  %s2443_s23 = smov [#allocation2]   ;;  %s424_s17 = int_to_ptr.vmem [resolvable:$true] %s423_s17 }
  0x19   : > { %s3178_s30 = scalar_select %p2597_p10, 1, 0 }
  0x1a   : > { %p2090_p11 = pneg %p2597_p10  ;;  %s412_s25 = sshll.u32 %s2443_s23, 4  ;;  %s2609_s25 = int_to_ptr.vmem [resolvable:$true] %s412_s25 }
  0x1b   : > { %s2444_s27 = smov [#allocation7]   ;;  %s2254_s16 = scalar_lea.hbm %s3146_s7, 16 }
  0x1c   : > { %p2605_p12 = pnand %p3162_p9, %p2090_p11  ;;  %s434_s20 = sshll.u32 %s2444_s27, 4  ;;  %s2611_s20 = int_to_ptr.vmem [resolvable:$true] %s434_s20 }
  0x1d   : > { %p2255_p13 = scmp.ne.s32.totalorder %s3146_s7, %s2254_s16  ;;  %p2261_p3 = scmp.lt.u32.totalorder %s2254_s16, %s3146_s7 }
  0x1e   : > { %p2621_p0 = pneg %p2605_p12 }
  0x20   : > { %p2257_p1 = pnand %p2621_p0, %p2255_p13 }
  0x22   : > { %p2258_p2 = pneg %p2257_p1 }
  0x24   : > { %p2263_p4 = pnand %p2261_p3, %p2258_p2 }
  0x26   : > { %2266 = shalt.err (!%p2263_p4)
}
  0x27   : > { %s2267_s24 = scalar_lea.vmem %s424_s17, 16  ;;  %s2274_s18 = scalar_lea.vmem %s424_s17, 32 }
  0x28   : > { %p2268_p7 = scmp.ne.s32.totalorder %s424_s17, %s2267_s24  ;;  %p2275_p9 = scmp.lt.s32.totalorder %s424_s17, %s424_s17 }
  0x29   : > { %p2276_p6 = scmp.lt.s32.totalorder %s2274_s18, %s2267_s24 }
  0x2a   : > { %p2270_p8 = pnand %p2268_p7, %p2621_p0 }
  0x2b   : > { %p2277_p5 = por %p2276_p6, %p2275_p9 }
  0x2c   : > { %p2271_p11 = pneg %p2270_p8 }
  0x2e   : > { %p2278_p10 = pnand %p2277_p5, %p2271_p11 }
  0x30   : > { %2281 = shalt.err (!%p2278_p10)
}
  0x31   : > { %2096 = dma.hbm_to_vmem [thread:$0]  (!%p2605_p12), %s3146_s7, 16, %s424_s17, [#allocation6]  }
  0x32   : > { %s2282_s27 = scalar_lea.hbm %s3145_s6, 16 }
  0x33   : > { %p2283_p13 = scmp.ne.s32.totalorder %s3145_s6, %s2282_s27  ;;  %p2289_p5 = scmp.lt.u32.totalorder %s2282_s27, %s3145_s6 }
  0x35   : > { %p2285_p1 = pnand %p2283_p13, %p2621_p0 }
  0x37   : > { %p2286_p6 = pneg %p2285_p1 }
  0x39   : > { %p2291_p9 = pnand %p2289_p5, %p2286_p6 }
  0x3b   : > { %2294 = shalt.err (!%p2291_p9)
}
  0x3c   : > { %s2295_s17 = scalar_lea.vmem %s2609_s25, 16  ;;  %s2302_s14 = scalar_lea.vmem %s2609_s25, 32 }
  0x3d   : > { %p2296_p10 = scmp.ne.s32.totalorder %s2609_s25, %s2295_s17  ;;  %p2303_p4 = scmp.lt.s32.totalorder %s2609_s25, %s2609_s25 }
  0x3e   : > { %p2304_p7 = scmp.lt.s32.totalorder %s2302_s14, %s2295_s17 }
  0x3f   : > { %p2298_p2 = pnand %p2296_p10, %p2621_p0 }
  0x40   : > { %p2305_p8 = por %p2304_p7, %p2303_p4 }
  0x41   : > { %p2299_p3 = pneg %p2298_p2 }
  0x43   : > { %p2306_p11 = pnand %p2305_p8, %p2299_p3 }
  0x45   : > { %2309 = shalt.err (!%p2306_p11)
}
  0x46   : > { %2093 = dma.hbm_to_vmem [thread:$0]  (!%p2605_p12), %s3145_s6, 16, %s2609_s25, [#allocation3]  }
  0x47   : > { %s2310_s16 = scalar_lea.hbm %s3147_s8, 16 }
  0x48   : > { %p2311_p13 = scmp.ne.s32.totalorder %s3147_s8, %s2310_s16  ;;  %p2317_p5 = scmp.lt.u32.totalorder %s2310_s16, %s3147_s8 }
  0x4a   : > { %p2313_p1 = pnand %p2311_p13, %p2621_p0 }
  0x4c   : > { %p2314_p6 = pneg %p2313_p1 }
  0x4e   : > { %p2319_p9 = pnand %p2317_p5, %p2314_p6 }
  0x50   : > { %2322 = shalt.err (!%p2319_p9)
}
  0x51   : > { %s2323_s25 = scalar_lea.vmem %s2611_s20, 16  ;;  %s2330_s14 = scalar_lea.vmem %s2611_s20, 32 }
  0x52   : > { %p2324_p10 = scmp.ne.s32.totalorder %s2611_s20, %s2323_s25  ;;  %p2331_p4 = scmp.lt.s32.totalorder %s2611_s20, %s2611_s20 }
  0x53   : > { %p2332_p7 = scmp.lt.s32.totalorder %s2330_s14, %s2323_s25 }
  0x54   : > { %p2326_p2 = pnand %p2324_p10, %p2621_p0 }
  0x55   : > { %p2333_p8 = por %p2332_p7, %p2331_p4 }
  0x56   : > { %p2327_p3 = pneg %p2326_p2 }
  0x58   : > { %p2334_p11 = pnand %p2333_p8, %p2327_p3 }
  0x5a   : > { %2337 = shalt.err (!%p2334_p11)
}
  0x5b   : > { %2099 = dma.hbm_to_vmem [thread:$0]  (!%p2605_p12), %s3147_s8, 16, %s2611_s20, [#allocation6]  }
  0x5c   : > { %s2445_s29 = smov [#allocation8]   ;;  %s2338_s24 = scalar_lea.hbm %s3152_s13, 1024 }
  0x5d   : > { %s456_s15 = sshll.u32 %s2445_s29, 4  ;;  %p2339_p13 = scmp.ne.s32.totalorder %s3152_s13, %s2338_s24  ;;  %s457_s15 = int_to_ptr.vmem [resolvable:$true] %s456_s15 }
  0x5e   : > { %p2345_p5 = scmp.lt.u32.totalorder %s2338_s24, %s3152_s13 }
  0x5f   : > { %p2341_p1 = pnand %p2339_p13, %p2621_p0 }
  0x61   : > { %p2342_p6 = pneg %p2341_p1 }
  0x63   : > { %p2347_p9 = pnand %p2345_p5, %p2342_p6 }
  0x65   : > { %2350 = shalt.err (!%p2347_p9)
}
  0x66   : > { %s2351_s20 = scalar_lea.vmem %s457_s15, 1024  ;;  %p2359_p4 = scmp.lt.s32.totalorder %s457_s15, %s457_s15 }
  0x67   : > { %p2352_p10 = scmp.ne.s32.totalorder %s457_s15, %s2351_s20  ;;  %p2360_p7 = scmp.lt.s32.totalorder %s2351_s20, %s2351_s20 }
  0x69   : > { %p2354_p2 = pnand %p2352_p10, %p2621_p0  ;;  %p2361_p8 = por %p2360_p7, %p2359_p4 }
  0x6b   : > { %p2355_p3 = pneg %p2354_p2 }
  0x6d   : > { %p2362_p11 = pnand %p2361_p8, %p2355_p3 }
  0x6f   : > { %2365 = shalt.err (!%p2362_p11)
}
  0x70   : > { %s2446_s28 = smov 64   ;;  %s2447_s21 = smov 4  }
  0x71   : > { %2102 = dma.hbm_to_vmem [thread:$0]  (!%p2605_p12), %s3152_s13, 1024, %s457_s15, [#allocation9], %s2446_s28, %s2446_s28, %s2447_s21  }
  0x72   : > { %p3181_p13 = scmp.ne.s32.totalorder %s3178_s30, 0 }
  0x73   : > { %p3182_p1 = scmp.eq.s32.totalorder (!%p3181_p13), %s2569_s22, 0 }
  0x74   : > { %493 = sbr.rel (%p3181_p13) target bundleno = 1968 (0x7b0), region = 80 }
  0x7b   : > { %2411 = dma.done.wait (%p3182_p1), [#allocation3], 16   ;;  %p3183_p0 = pmov %p3182_p1 }
  0x7d   : > { %2413 = vsyncadd (%p3183_p0), [#allocation3], 4294967280  ;;  %p3184_p6 = pmov %p3183_p0 }
  0x7e   : > { %p3185_p5 = pmov %p3183_p0 }
  0x7f   : > { %2415 = dma.done.wait (%p3184_p6), [#allocation6], 32  }
  0x80   : > { %2417 = vsyncadd (%p3185_p5), [#allocation6], 4294967264  ;;  %p3186_p9 = pmov %p3183_p0 }
  0x81   : > { %p3187_p12 = pmov %p3183_p0 }
  0x82   : > { %2419 = dma.done.wait (%p3186_p9), [#allocation9], 1024  }
  0x83   : > { %2421 = vsyncadd (%p3187_p12), [#allocation9], 4294966272  ;;  %s1838_s30 = sshll.u32 %s2569_s22, 2  ;;  %v2448_v0 = vmov 1   ;;  %v2449_v1 = vmov 0   ;;  %v2450_v6 = vmov 2   ;;  %v596_v20 = vlaneseq }
  0x84   : > { %2174 = vset.pattern.permute.xlu1 %v2448_v0  ;;  %2173 = vset.pattern.permute.xlu0 %v2449_v1  ;;  %p559_p10 = scmp.lt.s32.totalorder %s1838_s30, 7  ;;  %v2451_v7 = vmov 3   ;;  %v2452_v8 = vmov 4   ;;  %v2453_v9 = vmov 5   ;;  %v2454_v10 = vmov 6   ;;  %v2206_v32 = vld [vmem:[%s3141_s2] sm:$0xff]  }
  0x85   : > { %v2455_v11 = vmov 7   ;;  %v2456_v12 = vmov 8   ;;  %v2457_v13 = vmov 9   ;;  %v2458_v14 = vmov 10   ;;  %1992 = vmatprep.subr.bf16.mxu0 %v2206_v32  ;;  %v2207_v37 = vld [vmem:[%s3141_s2 + $0x8] sm:$0xff]   ;;  %v2208_v41 = vld [vmem:[%s3141_s2 + $0x10] sm:$0xff]  }
  0x86   : > { %s3202_s30 = smov (!%p559_p10, %s1838_s30), 7  ;;  %v2459_v15 = vmov 11   ;;  %v2460_v16 = vmov 12   ;;  %v2461_v17 = vmov 13   ;;  %v2462_v18 = vmov 14   ;;  %1993 = vmatpush3.bf16.msra.mxu0 %v2206_v32  ;;  %v2209_v45 = vld [vmem:[%s3141_s2 + $0x18] sm:$0xff]  }
  0x87   : > { %s1839_s26 = sshll.u32 %s3202_s30, 3  ;;  %v2463_v19 = vmov 15   ;;  %v2790_v21 = vand.u32 127, %v596_v20  ;;  %v2464_v24 = vmov 0.0   ;;  %1994 = vmatprep.subr.bf16.mxu0 %v2207_v37  ;;  %v2210_v50 = vld [vmem:[%s3141_s2 + $0x20] sm:$0xff]   ;;  %v2211_v60 = vld [vmem:[%s3141_s2 + $0x28] sm:$0xff]  }
  0x88   : > { %s562_s27 = scalar_lea.vmem %s3139_s0, %s1839_s26  ;;  %s2868_s20 = scalar_lea.vmem %s3140_s1, %s1839_s26 }
  0x89   : > { %v2726_v2 = vld [vmem:[%s562_s27] sm:$0xff]  ;;  %v2730_v3 = vld [vmem:[%s562_s27 + $0x8] sm:$0xff]  ;;  %v2732_v4 = vld [vmem:[%s562_s27 + $0x10] sm:$0xff]  ;;  %s555_s25 = sand.u32 1, %s2432_s19   ;;  %s3188_s21 = sld [smem:[#allocation22_spill]] }
  0x8a   : > { %627 = vperm.xlu1 %2174, %v2726_v2   ;;  %599 = vperm.xlu0 %2173, %v2726_v2   ;;  %v2736_v5 = vld [vmem:[%s562_s27 + $0x18] sm:$0xff]  ;;  %s1837_s14 = sshll.u32 %s555_s25, 5  ;;  %s1951_s30 = sshll.u32 %s2569_s22, 9 }
  0x8b   : > { %1995 = vmatpush3.bf16.msra.mxu0 %v2207_v37  ;;  %s557_s29 = scalar_lea.vmem [#allocation10], %s1837_s14  ;;  %s3189_s26 = sld [smem:[#allocation20_spill]] }
  0x8c   : > { %1996 = vmatprep.subr.bf16.mxu0 %v2208_v41  ;;  %s1710_s16 = sshll.u32 %s557_s29, 4  ;;  %s3190_s27 = sld [smem:[#allocation23_spill]]  ;;  %s3091_s16 = int_to_ptr.vmem [resolvable:$true] %s1710_s16 }
  0x8d   : > { %s3098_s22 = scalar_lea.sflag [#allocation4], %s555_s25  ;;  %s2366_s18 = scalar_lea.vmem %s3091_s16, 512 }
  0x8e   : > { %630 = vperm.xlu1 %2174, %v2730_v3   ;;  %602 = vperm.xlu0 %2173, %v2730_v3   ;;  %p2367_p2 = scmp.ne.s32.totalorder %s3091_s16, %s2366_s18  ;;  %s2465_s17 = smov [#allocation10]  }
  0x8f   : > { %1997 = vmatpush3.bf16.msra.mxu0 %v2208_v41  ;;  %s2370_s14 = sshll.u32 %s2465_s17, 4  ;;  %s2371_s14 = int_to_ptr.vmem [resolvable:$false] %s2370_s14 }
  0x90   : > { %1998 = vmatprep.subr.bf16.mxu0 %v2209_v45  ;;  %p2373_p8 = scmp.lt.s32.totalorder %s3091_s16, %s2371_s14 }
  0x91   : > { %p3191_p3 = scmp.ne.s32.totalorder %s3189_s26, 0 }
  0x92   : > { %2175 = vset.pattern.permute.xlu1 %v2449_v1  ;;  %605 = vperm.xlu0 %2173, %v2732_v4   ;;  %s3096_s24 = scalar_lea.hbm %s3190_s27, %s1951_s30 }
  0x93   : > { %608 = vperm.xlu1 %2175, %v2736_v5   ;;  %1999 = vmatpush3.bf16.msra.mxu0 %v2209_v45  ;;  %v2218_v45 = vld [vmem:[%s3144_s5 + $0x20] sm:$0xff]   ;;  %p2368_p4 = pnand %p2367_p2, %p3191_p3 }
  0x94   : > { %2000 = vmatprep.subr.bf16.mxu0 %v2210_v50 }
  0x95   : > { %p2369_p7 = pneg %p2368_p4 }
  0x96   : > { %2176 = vset.pattern.permute.xlu0 %v2448_v0 }
  0x97   : > { %2177 = vset.pattern.permute.xlu1 %v2448_v0  ;;  %633 = vperm.xlu0 %2176, %v2732_v4  }
  0x98   : > { %636 = vperm.xlu1 %2177, %v2736_v5   ;;  %2001 = vmatpush3.bf16.msra.mxu0 %v2210_v50 }
  0x99   : > { %2002 = vmatprep.subr.bf16.mxu0 %v2211_v60 }
  0x9b   : > { %2179 = vset.pattern.permute.xlu0 %v2450_v6 }
  0x9c   : > { %2178 = vset.pattern.permute.xlu1 %v2450_v6  ;;  %658 = vperm.xlu0 %2179, %v2730_v3  }
  0x9d   : > { %655 = vperm.xlu1 %2178, %v2726_v2   ;;  %2003 = vmatpush3.bf16.msra.mxu0 %v2211_v60  ;;  %v579_v60 = vld [vmem:[%s2868_s20 + $0x18] sm:$0xff] }
  0xa0   : > { %2180 = vset.pattern.permute.xlu0 %v2451_v7 }
  0xa1   : > { %661 = vperm.xlu1 %2178, %v2732_v4   ;;  %683 = vperm.xlu0 %2180, %v2726_v2  }
  0xa5   : > { %664 = vperm.xlu1 %2178, %v2736_v5   ;;  %692 = vperm.xlu0 %2180, %v2736_v5  }
  0xa9   : > { %2181 = vset.pattern.permute.xlu1 %v2451_v7  ;;  %2183 = vset.pattern.permute.xlu0 %v2452_v8 }
  0xaa   : > { %686 = vperm.xlu1 %2181, %v2730_v3   ;;  %714 = vperm.xlu0 %2183, %v2730_v3  }
  0xae   : > { %689 = vperm.xlu1 %2181, %v2732_v4   ;;  %2184 = vset.pattern.permute.xlu0 %v2453_v9 }
  0xaf   : > { %739 = vperm.xlu0 %2184, %v2726_v2  }
  0xb2   : > { %2182 = vset.pattern.permute.xlu1 %v2452_v8 }
  0xb3   : > { %711 = vperm.xlu1 %2182, %v2726_v2   ;;  %748 = vperm.xlu0 %2184, %v2736_v5  }
  0xb7   : > { %717 = vperm.xlu1 %2182, %v2732_v4   ;;  %2187 = vset.pattern.permute.xlu0 %v2454_v10 }
  0xb8   : > { %770 = vperm.xlu0 %2187, %v2730_v3  }
  0xbb   : > { %720 = vperm.xlu1 %2182, %v2736_v5  }
  0xbc   : > { %2188 = vset.pattern.permute.xlu0 %v2455_v11 }
  0xbd   : > { %795 = vperm.xlu0 %2188, %v2726_v2  }
  0xbf   : > { %2185 = vset.pattern.permute.xlu1 %v2453_v9 }
  0xc0   : > { %742 = vperm.xlu1 %2185, %v2730_v3  }
  0xc1   : > { %804 = vperm.xlu0 %2188, %v2736_v5  }
  0xc4   : > { %745 = vperm.xlu1 %2185, %v2732_v4  }
  0xc5   : > { %2191 = vset.pattern.permute.xlu0 %v2456_v12 }
  0xc6   : > { %826 = vperm.xlu0 %2191, %v2730_v3  }
  0xc8   : > { %2186 = vset.pattern.permute.xlu1 %v2454_v10 }
  0xc9   : > { %767 = vperm.xlu1 %2186, %v2726_v2  }
  0xca   : > { %2192 = vset.pattern.permute.xlu0 %v2457_v13 }
  0xcb   : > { %851 = vperm.xlu0 %2192, %v2726_v2  }
  0xcd   : > { %773 = vperm.xlu1 %2186, %v2732_v4  }
  0xcf   : > { %860 = vperm.xlu0 %2192, %v2736_v5  }
  0xd1   : > { %776 = vperm.xlu1 %2186, %v2736_v5  }
  0xd3   : > { %2195 = vset.pattern.permute.xlu0 %v2458_v14 }
  0xd4   : > { %882 = vperm.xlu0 %2195, %v2730_v3  }
  0xd5   : > { %2189 = vset.pattern.permute.xlu1 %v2455_v11 }
  0xd6   : > { %798 = vperm.xlu1 %2189, %v2730_v3  }
  0xd8   : > { %2196 = vset.pattern.permute.xlu0 %v2459_v15 }
  0xd9   : > { %907 = vperm.xlu0 %2196, %v2726_v2  }
  0xda   : > { %801 = vperm.xlu1 %2189, %v2732_v4  }
  0xdd   : > { %916 = vperm.xlu0 %2196, %v2736_v5  }
  0xde   : > { %2190 = vset.pattern.permute.xlu1 %v2456_v12 }
  0xdf   : > { %823 = vperm.xlu1 %2190, %v2726_v2  }
  0xe1   : > { %2199 = vset.pattern.permute.xlu0 %v2460_v16 }
  0xe2   : > { %938 = vperm.xlu0 %2199, %v2730_v3  }
  0xe3   : > { %829 = vperm.xlu1 %2190, %v2732_v4  }
  0xe6   : > { %2200 = vset.pattern.permute.xlu0 %v2461_v17 }
  0xe7   : > { %832 = vperm.xlu1 %2190, %v2736_v5   ;;  %963 = vperm.xlu0 %2200, %v2726_v2  }
  0xeb   : > { %2193 = vset.pattern.permute.xlu1 %v2457_v13  ;;  %972 = vperm.xlu0 %2200, %v2736_v5  }
  0xec   : > { %854 = vperm.xlu1 %2193, %v2730_v3  }
  0xef   : > { %2203 = vset.pattern.permute.xlu0 %v2462_v18 }
  0xf0   : > { %857 = vperm.xlu1 %2193, %v2732_v4   ;;  %994 = vperm.xlu0 %2203, %v2730_v3  }
  0xf4   : > { %2194 = vset.pattern.permute.xlu1 %v2458_v14  ;;  %2204 = vset.pattern.permute.xlu0 %v2463_v19 }
  0xf5   : > { %879 = vperm.xlu1 %2194, %v2726_v2   ;;  %1019 = vperm.xlu0 %2204, %v2726_v2  }
  0xf9   : > { %885 = vperm.xlu1 %2194, %v2732_v4   ;;  %1028 = vperm.xlu0 %2204, %v2736_v5  }
  0xfd   : > { %888 = vperm.xlu1 %2194, %v2736_v5  }
 0x101   : > { %2197 = vset.pattern.permute.xlu1 %v2459_v15 }
 0x102   : > { %910 = vperm.xlu1 %2197, %v2730_v3  }
 0x106   : > { %913 = vperm.xlu1 %2197, %v2732_v4  }
 0x109   : > { %v628_v22 = vpop.permute.xlu1 %627  ;;  %v600_v23 = vpop.permute.xlu0 %599 }
 0x10a   : > { %vm638_vm0 = vcmp.eq.s32.totalorder %v2790_v21, %v628_v22  ;;  %vm610_vm1 = vcmp.eq.s32.totalorder %v2790_v21, %v600_v23  ;;  %2198 = vset.pattern.permute.xlu1 %v2460_v16  ;;  %v2214_v16 = vld [vmem:[%s3144_s5] sm:$0xff]   ;;  %v578_v22 = vld [vmem:[%s2868_s20 + $0x10] sm:$0xff] }
 0x10b   : > { %v1846_v25 = vsel %vm638_vm0, 1.0, %v2464_v24  ;;  %v1842_v26 = vsel %vm610_vm1, 1.0, %v2464_v24  ;;  %935 = vperm.xlu1 %2198, %v2726_v2   ;;  %2012 = vmatprep.subr.bf16.mxu1 %v2214_v16 }
 0x10c   : > { %v650_v27 = vadd.f32 %v1846_v25, %v1842_v26  ;;  %2013 = vmatpush3.bf16.msra.mxu1 %v2214_v16 }
 0x10d   : > { %v631_v28 = vpop.permute.xlu1 %630  ;;  %v603_v29 = vpop.permute.xlu0 %602 }
 0x10e   : > { %vm639_vm5 = vcmp.eq.s32.totalorder %v2790_v21, %v631_v28  ;;  %vm611_vm6 = vcmp.eq.s32.totalorder %v2790_v21, %v603_v29  ;;  %v2216_v29 = vld [vmem:[%s3144_s5 + $0x10] sm:$0xff]  }
 0x10f   : > { %941 = vperm.xlu1 %2198, %v2732_v4   ;;  %v1847_v47 = vsel %vm639_vm5, 1.0, %v2464_v24  ;;  %v1843_v48 = vsel %vm611_vm6, 1.0, %v2464_v24 }
 0x110   : > { %v651_v55 = vadd.f32 %v1847_v47, %v1843_v48 }
 0x111   : > { %v606_v31 = vpop.permute.xlu0 %605 }
 0x112   : > { %v609_v30 = vpop.permute.xlu1 %608  ;;  %vm612_vm7 = vcmp.eq.s32.totalorder %v2790_v21, %v606_v31 }
 0x113   : > { %944 = vperm.xlu1 %2198, %v2736_v5   ;;  %vm613_vm2 = vcmp.eq.s32.totalorder %v2790_v21, %v609_v30  ;;  %v1844_v51 = vsel %vm612_vm7, 1.0, %v2464_v24 }
 0x114   : > { %v1845_v34 = vsel %vm613_vm2, 1.0, %v2464_v24  ;;  %vm1048_vm2 = vcmask 130048  }
 0x115   : > { %v1055_v28 = vsel %vm1048_vm2, %v578_v22, 0.0 }
 0x116   : > { %v634_v38 = vpop.permute.xlu0 %633 }
 0x117   : > { %2201 = vset.pattern.permute.xlu1 %v2461_v17  ;;  %v637_v33 = vpop.permute.xlu1 %636  ;;  %vm640_vm8 = vcmp.eq.s32.totalorder %v2790_v21, %v634_v38  ;;  %v2215_v17 = vld [vmem:[%s3144_s5 + $0x8] sm:$0xff]  }
 0x118   : > { %vm641_vm3 = vcmp.eq.s32.totalorder %v2790_v21, %v637_v33  ;;  %966 = vperm.xlu1 %2201, %v2730_v3   ;;  %v1848_v52 = vsel %vm640_vm8, 1.0, %v2464_v24  ;;  %2014 = vmatprep.subr.bf16.mxu1 %v2215_v17 }
 0x119   : > { %v1849_v35 = vsel %vm641_vm3, 1.0, %v2464_v24  ;;  %v652_v57 = vadd.f32 %v1848_v52, %v1844_v51  ;;  %2015 = vmatpush3.bf16.msra.mxu1 %v2215_v17 }
 0x11a   : > { %v653_v36 = vadd.f32 %v1849_v35, %v1845_v34  ;;  %2016 = vmatprep.subr.bf16.mxu1 %v2216_v29  ;;  %v2217_v35 = vld [vmem:[%s3144_s5 + $0x18] sm:$0xff]  }
 0x11b   : > { %v659_v44 = vpop.permute.xlu0 %658 }
 0x11c   : > { %969 = vperm.xlu1 %2201, %v2732_v4   ;;  %v656_v39 = vpop.permute.xlu1 %655  ;;  %vm667_vm9 = vcmp.eq.s32.totalorder %v2790_v21, %v659_v44 }
 0x11d   : > { %vm666_vm4 = vcmp.eq.s32.totalorder %v2790_v21, %v656_v39  ;;  %v1851_v53 = vsel %vm667_vm9, 1.0, %v2464_v24  ;;  %2017 = vmatpush3.bf16.msra.mxu1 %v2216_v29 }
 0x11e   : > { %v1850_v40 = vsel %vm666_vm4, 1.0, %v2464_v24  ;;  %v679_v58 = vadd.f32 %v1851_v53, %v651_v55  ;;  %2018 = vmatprep.subr.bf16.mxu1 %v2217_v35 }
 0x11f   : > { %v678_v42 = vadd.f32 %v1850_v40, %v650_v27 }
 0x120   : > { %2202 = vset.pattern.permute.xlu1 %v2462_v18  ;;  %v662_v43 = vpop.permute.xlu1 %661  ;;  %v684_v59 = vpop.permute.xlu0 %683 }
 0x121   : > { %991 = vperm.xlu1 %2202, %v2726_v2   ;;  %vm668_vm11 = vcmp.eq.s32.totalorder %v2790_v21, %v662_v43  ;;  %vm694_vm13 = vcmp.eq.s32.totalorder %v2790_v21, %v684_v59  ;;  %v2212_v2 = vld [vmem:[%s3141_s2 + $0x30] sm:$0xff]   ;;  %2019 = vmatpush3.bf16.msra.mxu1 %v2217_v35 }
 0x122   : > { %v1852_v61 = vsel %vm668_vm11, 1.0, %v2464_v24  ;;  %v1854_v6 = vsel %vm694_vm13, 1.0, %v2464_v24  ;;  %2004 = vmatprep.subr.bf16.mxu0 %v2212_v2  ;;  %2020 = vmatprep.subr.bf16.mxu1 %v2218_v45 }
 0x123   : > { %v680_v1 = vadd.f32 %v1852_v61, %v652_v57  ;;  %2005 = vmatpush3.bf16.msra.mxu0 %v2212_v2  ;;  %v706_v10 = vadd.f32 %v1854_v6, %v678_v42 }
 0x124   : > { %v665_v46 = vpop.permute.xlu1 %664  ;;  %v693_v8 = vpop.permute.xlu0 %692 }
 0x125   : > { %vm669_vm10 = vcmp.eq.s32.totalorder %v2790_v21, %v665_v46  ;;  %997 = vperm.xlu1 %2202, %v2732_v4   ;;  %vm697_vm0 = vcmp.eq.s32.totalorder %v2790_v21, %v693_v8  ;;  %2021 = vmatpush3.bf16.msra.mxu1 %v2218_v45 }
 0x126   : > { %v1853_v49 = vsel %vm669_vm10, 1.0, %v2464_v24 }
 0x127   : > { %v681_v54 = vadd.f32 %v1853_v49, %v653_v36 }
 0x129   : > { %1000 = vperm.xlu1 %2202, %v2736_v5   ;;  %v687_v56 = vpop.permute.xlu1 %686  ;;  %v715_v14 = vpop.permute.xlu0 %714 }
 0x12a   : > { %vm695_vm12 = vcmp.eq.s32.totalorder %v2790_v21, %v687_v56  ;;  %vm723_vm3 = vcmp.eq.s32.totalorder %v2790_v21, %v715_v14 }
 0x12b   : > { %v1855_v62 = vsel %vm695_vm12, 1.0, %v2464_v24  ;;  %v1859_v30 = vsel %vm723_vm3, 1.0, %v2464_v24 }
 0x12c   : > { %v707_v63 = vadd.f32 %v1855_v62, %v679_v58 }
 0x12d   : > { %2205 = vset.pattern.permute.xlu1 %v2463_v19  ;;  %v690_v0 = vpop.permute.xlu1 %689  ;;  %v577_v19 = vld [vmem:[%s2868_s20 + $0x8] sm:$0xff] }
 0x12e   : > { %vm696_vm14 = vcmp.eq.s32.totalorder %v2790_v21, %v690_v0  ;;  %1022 = vperm.xlu1 %2205, %v2730_v3   ;;  %v2213_v3 = vld [vmem:[%s3141_s2 + $0x38] sm:$0xff]   ;;  %v1052_v25 = vsel %vm1048_vm2, %v577_v19, 0.0  ;;  %v735_v33 = vadd.f32 %v1859_v30, %v707_v63  ;;  %v740_v34 = vpop.permute.xlu0 %739  ;;  %v1058_v0 = vsel %vm1048_vm2, %v579_v60, 0.0 }
 0x12f   : > { %v1856_v5 = vsel %vm696_vm14, 1.0, %v2464_v24  ;;  %2006 = vmatprep.subr.bf16.mxu0 %v2213_v3  ;;  %1053 = vadd.xlane.f32.xlu0 %v1052_v25  ;;  %vm750_vm6 = vcmp.eq.s32.totalorder %v2790_v21, %v740_v34 }
 0x130   : > { %v708_v7 = vadd.f32 %v1856_v5, %v680_v1  ;;  %2007 = vmatpush3.bf16.msra.mxu0 %v2213_v3  ;;  %v1862_v40 = vsel %vm750_vm6, 1.0, %v2464_v24 }
 0x132   : > { %1025 = vperm.xlu1 %2205, %v2732_v4   ;;  %v712_v9 = vpop.permute.xlu1 %711  ;;  %v1857_v4 = vsel %vm697_vm0, 1.0, %v2464_v24  ;;  %v749_v42 = vpop.permute.xlu0 %748 }
 0x133   : > { %vm722_vm15 = vcmp.eq.s32.totalorder %v2790_v21, %v712_v9  ;;  %v709_v26 = vadd.f32 %v1857_v4, %v681_v54  ;;  %1056 = vadd.xlane.f32.xlu0 %v1055_v28  ;;  %vm753_vm9 = vcmp.eq.s32.totalorder %v2790_v21, %v749_v42  ;;  %v576_v54 = vld [vmem:[%s2868_s20] sm:$0xff]  ;;  %v2219_v9 = vld [vmem:[%s3144_s5 + $0x28] sm:$0xff]   ;;  %s2372_s20 = scalar_lea.vmem %s2371_s14, 1024 }
 0x134   : > { %v1858_v11 = vsel %vm722_vm15, 1.0, %v2464_v24  ;;  %v1865_v50 = vsel %vm753_vm9, 1.0, %v2464_v24  ;;  %v1049_v59 = vsel %vm1048_vm2, %v576_v54, 0.0  ;;  %2022 = vmatprep.subr.bf16.mxu1 %v2219_v9  ;;  %p2374_p11 = scmp.lt.s32.totalorder %s2372_s20, %s2366_s18 }
 0x135   : > { %v734_v12 = vadd.f32 %v1858_v11, %v706_v10  ;;  %2023 = vmatpush3.bf16.msra.mxu1 %v2219_v9 }
 0x136   : > { %v718_v13 = vpop.permute.xlu1 %717  ;;  %p2375_p13 = por %p2374_p11, %p2373_p8 }
 0x137   : > { %vm724_vm1 = vcmp.eq.s32.totalorder %v2790_v21, %v718_v13  ;;  %v762_v44 = vadd.f32 %v1862_v40, %v734_v12  ;;  %v771_v49 = vpop.permute.xlu0 %770 }
 0x138   : > { %v1860_v15 = vsel %vm724_vm1, 1.0, %v2464_v24  ;;  %vm779_vm11 = vcmp.eq.s32.totalorder %v2790_v21, %v771_v49  ;;  %p2376_p1 = pnand %p2375_p13, %p2369_p7 }
 0x139   : > { %v736_v18 = vadd.f32 %v1860_v15, %v708_v7  ;;  %v1867_v57 = vsel %vm779_vm11, 1.0, %v2464_v24 }
 0x13a   : > { %v721_v23 = vpop.permute.xlu1 %720 }
 0x13b   : > { %vm725_vm4 = vcmp.eq.s32.totalorder %v2790_v21, %v721_v23 }
 0x13c   : > { %v1861_v27 = vsel %vm725_vm4, 1.0, %v2464_v24  ;;  %v796_v11 = vpop.permute.xlu0 %795 }
 0x13d   : > { %v737_v31 = vadd.f32 %v1861_v27, %v709_v26  ;;  %vm806_vm15 = vcmp.eq.s32.totalorder %v2790_v21, %v796_v11 }
 0x13f   : > { %v743_v32 = vpop.permute.xlu1 %742  ;;  %v765_v55 = vadd.f32 %v1865_v50, %v737_v31  ;;  %v1870_v31 = vsel %vm806_vm15, 1.0, %v2464_v24 }
 0x140   : > { %vm751_vm5 = vcmp.eq.s32.totalorder %v2790_v21, %v743_v32  ;;  %v805_v13 = vpop.permute.xlu0 %804 }
 0x141   : > { %v1863_v36 = vsel %vm751_vm5, 1.0, %v2464_v24  ;;  %vm809_vm1 = vcmp.eq.s32.totalorder %v2790_v21, %v805_v13 }
 0x142   : > { %v763_v37 = vadd.f32 %v1863_v36, %v735_v33  ;;  %v1873_v36 = vsel %vm809_vm1, 1.0, %v2464_v24 }
 0x143   : > { %v746_v38 = vpop.permute.xlu1 %745 }
 0x144   : > { %vm752_vm7 = vcmp.eq.s32.totalorder %v2790_v21, %v746_v38  ;;  %v791_v62 = vadd.f32 %v1867_v57, %v763_v37 }
 0x145   : > { %v1864_v39 = vsel %vm752_vm7, 1.0, %v2464_v24  ;;  %v827_v4 = vpop.permute.xlu0 %826 }
 0x146   : > { %v764_v41 = vadd.f32 %v1864_v39, %v736_v18  ;;  %vm835_vm2 = vcmp.eq.s32.totalorder %v2790_v21, %v827_v4 }
 0x147   : > { %v1875_v37 = vsel %vm835_vm2, 1.0, %v2464_v24 }
 0x148   : > { %v768_v43 = vpop.permute.xlu1 %767 }
 0x149   : > { %vm778_vm8 = vcmp.eq.s32.totalorder %v2790_v21, %v768_v43 }
 0x14a   : > { %v1866_v46 = vsel %vm778_vm8, 1.0, %v2464_v24  ;;  %v852_v16 = vpop.permute.xlu0 %851 }
 0x14b   : > { %v790_v47 = vadd.f32 %v1866_v46, %v762_v44  ;;  %vm862_vm3 = vcmp.eq.s32.totalorder %v2790_v21, %v852_v16 }
 0x14c   : > { %v774_v48 = vpop.permute.xlu1 %773  ;;  %v1878_v39 = vsel %vm862_vm3, 1.0, %v2464_v24 }
 0x14d   : > { %vm780_vm10 = vcmp.eq.s32.totalorder %v2790_v21, %v774_v48  ;;  %v818_v33 = vadd.f32 %v1870_v31, %v790_v47 }
 0x14e   : > { %v1868_v51 = vsel %vm780_vm10, 1.0, %v2464_v24  ;;  %v861_v18 = vpop.permute.xlu0 %860 }
 0x14f   : > { %v792_v52 = vadd.f32 %v1868_v51, %v764_v41  ;;  %vm865_vm7 = vcmp.eq.s32.totalorder %v2790_v21, %v861_v18 }
 0x150   : > { %v777_v53 = vpop.permute.xlu1 %776  ;;  %v1881_v50 = vsel %vm865_vm7, 1.0, %v2464_v24 }
 0x151   : > { %vm781_vm12 = vcmp.eq.s32.totalorder %v2790_v21, %v777_v53 }
 0x152   : > { %v1869_v56 = vsel %vm781_vm12, 1.0, %v2464_v24 }
 0x153   : > { %v793_v58 = vadd.f32 %v1869_v56, %v765_v55  ;;  %v883_v22 = vpop.permute.xlu0 %882 }
 0x154   : > { %vm891_vm8 = vcmp.eq.s32.totalorder %v2790_v21, %v883_v22 }
 0x155   : > { %v799_v61 = vpop.permute.xlu1 %798  ;;  %v821_v44 = vadd.f32 %v1873_v36, %v793_v58  ;;  %v1883_v51 = vsel %vm891_vm8, 1.0, %v2464_v24 }
 0x156   : > { %vm807_vm13 = vcmp.eq.s32.totalorder %v2790_v21, %v799_v61  ;;  %1050 = vadd.xlane.f32.xlu1 %v1049_v59 }
 0x157   : > { %v1871_v63 = vsel %vm807_vm13, 1.0, %v2464_v24 }
 0x158   : > { %v819_v1 = vadd.f32 %v1871_v63, %v791_v62  ;;  %v908_v25 = vpop.permute.xlu0 %907 }
 0x159   : > { %v802_v2 = vpop.permute.xlu1 %801  ;;  %vm918_vm10 = vcmp.eq.s32.totalorder %v2790_v21, %v908_v25 }
 0x15a   : > { %vm808_vm14 = vcmp.eq.s32.totalorder %v2790_v21, %v802_v2  ;;  %1059 = vadd.xlane.f32.xlu1 %v1058_v0  ;;  %v847_v45 = vadd.f32 %v1875_v37, %v819_v1  ;;  %v1886_v53 = vsel %vm918_vm10, 1.0, %v2464_v24 }
 0x15b   : > { %v1872_v5 = vsel %vm808_vm14, 1.0, %v2464_v24 }
 0x15c   : > { %v2917_v6 = vadd.f32 %v1872_v5, %v792_v52  ;;  %v917_v27 = vpop.permute.xlu0 %916 }
 0x15d   : > { %vm921_vm15 = vcmp.eq.s32.totalorder %v2790_v21, %v917_v27 }
 0x15e   : > { %v824_v7 = vpop.permute.xlu1 %823  ;;  %v1889_v0 = vsel %vm921_vm15, 1.0, %v2464_v24 }
 0x15f   : > { %vm834_vm0 = vcmp.eq.s32.totalorder %v2790_v21, %v824_v7 }
 0x160   : > { %v1874_v32 = vsel %vm834_vm0, 1.0, %v2464_v24 }
 0x161   : > { %v939_v30 = vpop.permute.xlu0 %938  ;;  %v846_v38 = vadd.f32 %v1874_v32, %v818_v33 }
 0x162   : > { %v2919_v8 = vpop.permute.xlu1 %829  ;;  %vm947_vm0 = vcmp.eq.s32.totalorder %v2790_v21, %v939_v30 }
 0x163   : > { %v874_v47 = vadd.f32 %v1878_v39, %v846_v38  ;;  %vm836_vm9 = vcmp.eq.s32.totalorder %v2790_v21, %v2919_v8  ;;  %v1891_v8 = vsel %vm947_vm0, 1.0, %v2464_v24 }
 0x164   : > { %v1876_v55 = vsel %vm836_vm9, 1.0, %v2464_v24 }
 0x165   : > { %v848_v7 = vadd.f32 %v1876_v55, %v2917_v6  ;;  %v1906_v55 = vld [vmem:[%s3142_s3] ss:$0 sm:$0xff] }
 0x166   : > { %v833_v3 = vpop.permute.xlu1 %832  ;;  %v964_v34 = vpop.permute.xlu0 %963 }
 0x167   : > { %vm837_vm4 = vcmp.eq.s32.totalorder %v2790_v21, %v833_v3  ;;  %vm974_vm1 = vcmp.eq.s32.totalorder %v2790_v21, %v964_v34 }
 0x168   : > { %v1877_v40 = vsel %vm837_vm4, 1.0, %v2464_v24  ;;  %v1894_v3 = vsel %vm974_vm1, 1.0, %v2464_v24 }
 0x169   : > { %v849_v48 = vadd.f32 %v1877_v40, %v821_v44 }
 0x16a   : > { %v2950_v42 = vpop.permute.xlu0 %972 }
 0x16b   : > { %v855_v10 = vpop.permute.xlu1 %854  ;;  %v877_v59 = vadd.f32 %v1881_v50, %v849_v48 }
 0x16c   : > { %vm863_vm5 = vcmp.eq.s32.totalorder %v2790_v21, %v855_v10 }
 0x16d   : > { %v1879_v41 = vsel %vm863_vm5, 1.0, %v2464_v24 }
 0x16e   : > { %v875_v49 = vadd.f32 %v1879_v41, %v847_v45 }
 0x16f   : > { %v2924_v12 = vpop.permute.xlu1 %857  ;;  %v995_v58 = vpop.permute.xlu0 %994 }
 0x170   : > { %vm864_vm14 = vcmp.eq.s32.totalorder %v2790_v21, %v2924_v12  ;;  %v903_v60 = vadd.f32 %v1883_v51, %v875_v49  ;;  %vm1003_vm8 = vcmp.eq.s32.totalorder %v2790_v21, %v995_v58 }
 0x171   : > { %v1880_v62 = vsel %vm864_vm14, 1.0, %v2464_v24 }
 0x172   : > { %v876_v12 = vadd.f32 %v1880_v62, %v848_v7 }
 0x174   : > { %v880_v14 = vpop.permute.xlu1 %879  ;;  %v1020_v10 = vpop.permute.xlu0 %1019 }
 0x175   : > { %vm890_vm6 = vcmp.eq.s32.totalorder %v2790_v21, %v880_v14  ;;  %vm1030_vm10 = vcmp.eq.s32.totalorder %v2790_v21, %v1020_v10 }
 0x176   : > { %v1882_v46 = vsel %vm890_vm6, 1.0, %v2464_v24  ;;  %vm977_vm6 = vcmp.eq.s32.totalorder %v2790_v21, %v2950_v42  ;;  %v1902_v32 = vsel %vm1030_vm10, 1.0, %v2464_v24 }
 0x177   : > { %v902_v52 = vadd.f32 %v1882_v46, %v874_v47  ;;  %v1897_v27 = vsel %vm977_vm6, 1.0, %v2464_v24 }
 0x178   : > { %v2926_v15 = vpop.permute.xlu1 %885  ;;  %v1029_v25 = vpop.permute.xlu0 %1028 }
 0x179   : > { %v930_v63 = vadd.f32 %v1886_v53, %v902_v52  ;;  %vm892_vm2 = vcmp.eq.s32.totalorder %v2790_v21, %v2926_v15  ;;  %vm1033_vm14 = vcmp.eq.s32.totalorder %v2790_v21, %v1029_v25  ;;  %v2220_v52 = vld [vmem:[%s3144_s5 + $0x30] sm:$0xff]   ;;  %v2221_v53 = vld [vmem:[%s3144_s5 + $0x38] sm:$0xff]  }
 0x17a   : > { %v1884_v11 = vsel %vm892_vm2, 1.0, %v2464_v24  ;;  %v1905_v44 = vsel %vm1033_vm14, 1.0, %v2464_v24  ;;  %2024 = vmatprep.subr.bf16.mxu1 %v2220_v52 }
 0x17b   : > { %v904_v16 = vadd.f32 %v1884_v11, %v876_v12  ;;  %2025 = vmatpush3.bf16.msra.mxu1 %v2220_v52  ;;  %v2227_v52 = vld [vmem:[%s3148_s9 + $0x28] sm:$0xff]  }
 0x17c   : > { %v889_v17 = vpop.permute.xlu1 %888  ;;  %2026 = vmatprep.subr.bf16.mxu1 %v2221_v53 }
 0x17d   : > { %vm893_vm11 = vcmp.eq.s32.totalorder %v2790_v21, %v889_v17 }
 0x17e   : > { %v1885_v56 = vsel %vm893_vm11, 1.0, %v2464_v24 }
 0x17f   : > { %v905_v1 = vadd.f32 %v1885_v56, %v877_v59  ;;  %2027 = vmatpush3.bf16.msra.mxu1 %v2221_v53  ;;  %v2228_v53 = vld [vmem:[%s3148_s9 + $0x30] sm:$0xff]  }
 0x181   : > { %v911_v19 = vpop.permute.xlu1 %910  ;;  %v933_v14 = vadd.f32 %v1889_v0, %v905_v1 }
 0x182   : > { %vm919_vm12 = vcmp.eq.s32.totalorder %v2790_v21, %v911_v19 }
 0x183   : > { %v1887_v57 = vsel %vm919_vm12, 1.0, %v2464_v24 }
 0x184   : > { %v931_v2 = vadd.f32 %v1887_v57, %v903_v60  ;;  %v1169_v57 = vld [vmem:[%s3143_s4] sm:$0x1] }
 0x185   : > { %v2928_v23 = vpop.permute.xlu1 %913  ;;  %v1170_v60 = vmul.f32 16.0, %v1169_v57 }
 0x186   : > { %vm920_vm5 = vcmp.eq.s32.totalorder %v2790_v21, %v2928_v23  ;;  %v959_v4 = vadd.f32 %v1891_v8, %v931_v2 }
 0x187   : > { %v1888_v17 = vsel %vm920_vm5, 1.0, %v2464_v24 }
 0x18a   : > { %v936_v26 = vpop.permute.xlu1 %935 }
 0x18b   : > { %vm946_vm13 = vcmp.eq.s32.totalorder %v2790_v21, %v936_v26 }
 0x18c   : > { %v1890_v61 = vsel %vm946_vm13, 1.0, %v2464_v24 }
 0x18d   : > { %v958_v9 = vadd.f32 %v1890_v61, %v930_v63 }
 0x18e   : > { %v2930_v28 = vpop.permute.xlu1 %941 }
 0x18f   : > { %vm948_vm9 = vcmp.eq.s32.totalorder %v2790_v21, %v2930_v28  ;;  %v986_v18 = vadd.f32 %v1894_v3, %v958_v9  ;;  %v1899_v28 = vsel %vm1003_vm8, 1.0, %v2464_v24 }
 0x190   : > { %v1892_v26 = vsel %vm948_vm9, 1.0, %v2464_v24 }
 0x192   : > { %v2933_v29 = vpop.permute.xlu1 %944 }
 0x193   : > { %vm949_vm3 = vcmp.eq.s32.totalorder %v2790_v21, %v2933_v29  ;;  %v932_v29 = vadd.f32 %v1888_v17, %v904_v16 }
 0x194   : > { %v1893_v6 = vsel %vm949_vm3, 1.0, %v2464_v24 }
 0x195   : > { %v961_v22 = vadd.f32 %v1893_v6, %v933_v14 }
 0x197   : > { %v967_v35 = vpop.permute.xlu1 %966  ;;  %v989_v36 = vadd.f32 %v1897_v27, %v961_v22 }
 0x198   : > { %vm975_vm4 = vcmp.eq.s32.totalorder %v2790_v21, %v967_v35  ;;  %v960_v35 = vadd.f32 %v1892_v26, %v932_v29 }
 0x199   : > { %v1895_v13 = vsel %vm975_vm4, 1.0, %v2464_v24 }
 0x19a   : > { %v987_v23 = vadd.f32 %v1895_v13, %v959_v4 }
 0x19b   : > { %v2952_v43 = vpop.permute.xlu1 %969 }
 0x19c   : > { %vm976_vm11 = vcmp.eq.s32.totalorder %v2790_v21, %v2952_v43  ;;  %v1015_v37 = vadd.f32 %v1899_v28, %v987_v23 }
 0x19d   : > { %v1896_v31 = vsel %vm976_vm11, 1.0, %v2464_v24 }
 0x19e   : > { %v988_v40 = vadd.f32 %v1896_v31, %v960_v35  ;;  %v2222_v31 = vld [vmem:[%s3148_s9] sm:$0xff]  }
 0x19f   : > { %2032 = vmatprep.subr.bf16.mxu0 %v2222_v31 }
 0x1a0   : > { %v992_v54 = vpop.permute.xlu1 %991 }
 0x1a1   : > { %vm1002_vm7 = vcmp.eq.s32.totalorder %v2790_v21, %v992_v54 }
 0x1a2   : > { %v1898_v19 = vsel %vm1002_vm7, 1.0, %v2464_v24 }
 0x1a3   : > { %v1014_v30 = vadd.f32 %v1898_v19, %v986_v18 }
 0x1a4   : > { %v998_v5 = vpop.permute.xlu1 %997 }
 0x1a5   : > { %vm1004_vm13 = vcmp.eq.s32.totalorder %v2790_v21, %v998_v5  ;;  %v1042_v42 = vadd.f32 %v1902_v32, %v1014_v30 }
 0x1a6   : > { %v1900_v38 = vsel %vm1004_vm13, 1.0, %v2464_v24 }
 0x1a7   : > { %v1016_v46 = vadd.f32 %v1900_v38, %v988_v40 }
 0x1a8   : > { %v1001_v15 = vpop.permute.xlu1 %1000 }
 0x1a9   : > { %vm1005_vm12 = vcmp.eq.s32.totalorder %v2790_v21, %v1001_v15  ;;  %v1915_v15 = vld [vmem:[#allocation2] ss:$0 sm:$0xff] }
 0x1aa   : > { %v1901_v33 = vsel %vm1005_vm12, 1.0, %v2464_v24 }
 0x1ab   : > { %v1017_v41 = vadd.f32 %v1901_v33, %v989_v36 }
 0x1ad   : > { %v1023_v34 = vpop.permute.xlu1 %1022  ;;  %v1045_v49 = vadd.f32 %v1905_v44, %v1017_v41 }
 0x1ae   : > { %vm1031_vm15 = vcmp.eq.s32.totalorder %v2790_v21, %v1023_v34 }
 0x1af   : > { %v1903_v39 = vsel %vm1031_vm15, 1.0, %v2464_v24 }
 0x1b0   : > { %v1043_v43 = vadd.f32 %v1903_v39, %v1015_v37 }
 0x1b1   : > { %v1026_v45 = vpop.permute.xlu1 %1025 }
 0x1b2   : > { %vm1032_vm0 = vcmp.eq.s32.totalorder %v2790_v21, %v1026_v45  ;;  %v1046_v47 = vpack.c.bf16 %v1043_v43, %v1042_v42 }
 0x1b3   : > { %v1904_v48 = vsel %vm1032_vm0, 1.0, %v2464_v24  ;;  %v1173_v24 = vshrl.u32 %v596_v20, 7 }
 0x1b4   : > { %v1044_v50 = vadd.f32 %v1904_v48, %v1016_v46  ;;  %2008 = vmatprep.mubr.bf16.mxu0 %v1046_v47  ;;  %v2223_v48 = vld [vmem:[%s3148_s9 + $0x8] sm:$0xff]  }
 0x1b5   : > { %v1174_v61 = vsub.s32 0, %v1173_v24 }
 0x1b6   : > { %v1047_v51 = vpack.c.bf16 %v1045_v49, %v1044_v50  ;;  %v2224_v49 = vld [vmem:[%s3148_s9 + $0x10] sm:$0xff]   ;;  %v2225_v50 = vld [vmem:[%s3148_s9 + $0x18] sm:$0xff]  }
 0x1b7   : > { %v1175_v2 = vrot.slane %v1170_v60, %v1174_v61 }
 0x1b8   : > { %2009 = vmatmul.mubr.bf16.vlgmr.msra.gmra.mrb[0].mxu0 %v1047_v51  ;;  %v2226_v51 = vld [vmem:[%s3148_s9 + $0x20] sm:$0xff]  }
 0x1b9   : > { %2033 = vmatpush3.bf16.msra.mxu0 %v2222_v31 }
 0x1ba   : > { %2034 = vmatprep.subr.bf16.mxu0 %v2223_v48 }
 0x1bc   : > { %v1054_v21 = vpop.xlane.xlu0 %1053 }
 0x1bd   : > { %v1069_v20 = vmul.f32 %v1906_v55, %v1054_v21  ;;  %2035 = vmatpush3.bf16.msra.mxu0 %v2223_v48  ;;  %v2229_v21 = vld [vmem:[%s3148_s9 + $0x38] sm:$0xff]  }
 0x1be   : > { %2036 = vmatprep.subr.bf16.mxu0 %v2224_v49 }
 0x1c0   : > { %v1057_v56 = vpop.xlane.xlu0 %1056 }
 0x1c1   : > { %v1070_v59 = vmul.f32 %v1906_v55, %v1057_v56  ;;  %2037 = vmatpush3.bf16.msra.mxu0 %v2224_v49 }
 0x1c2   : > { %2038 = vmatprep.subr.bf16.mxu0 %v2225_v50 }
 0x1c5   : > { %2039 = vmatpush3.bf16.msra.mxu0 %v2225_v50 }
 0x1c6   : > { %2040 = vmatprep.subr.bf16.mxu0 %v2226_v51 }
 0x1c9   : > { %2041 = vmatpush3.bf16.msra.mxu0 %v2226_v51 }
 0x1ca   : > { %2042 = vmatprep.subr.bf16.mxu0 %v2227_v52 }
 0x1cd   : > { %2043 = vmatpush3.bf16.msra.mxu0 %v2227_v52 }
 0x1ce   : > { %2044 = vmatprep.subr.bf16.mxu0 %v2228_v53 }
 0x1d1   : > { %2045 = vmatpush3.bf16.msra.mxu0 %v2228_v53  ;;  %v2231_v53 = vld [vmem:[#allocation8 + $0x8] sm:$0xff]  }
 0x1d2   : > { %2046 = vmatprep.subr.bf16.mxu0 %v2229_v21 }
 0x1d5   : > { %2047 = vmatpush3.bf16.msra.mxu0 %v2229_v21  ;;  %v2232_v21 = vld [vmem:[#allocation8 + $0x10] sm:$0xff]  }
 0x1e3   : > { %v1051_v54 = vpop.xlane.xlu1 %1050 }
 0x1e4   : > { %v1068_v62 = vmul.f32 %v1906_v55, %v1051_v54 }
 0x1e7   : > { %v1060_v58 = vpop.xlane.xlu1 %1059 }
 0x1e8   : > { %v1071_v63 = vmul.f32 %v1906_v55, %v1060_v58 }
 0x28b   : > { %v2010_v0 = vpop.f32.mrb[0].mxu0 }
 0x28c   : > { %v1163_v1 = vadd.f32 %v2010_v0, %v1070_v59  ;;  %v1154_v5 = vpop.f32.mrb[1].mxu0 }
 0x28d   : > { %v1155_v7 = vadd.f32 %v1154_v5, %v1068_v62  ;;  %v2011_v8 = vpop.f32.mrb[2].mxu0 }
 0x28e   : > { %v1166_v9 = vadd.f32 %v2011_v8, %v1071_v63  ;;  %v1157_v3 = vpop.f32.mrb[3].mxu0  ;;  %v1179_v11 = vadd.f32 %v1175_v2, %v1163_v1 }
 0x28f   : > { %v1158_v10 = vadd.f32 %v1157_v3, %v1069_v20  ;;  %v1177_v6 = vadd.f32 %v1175_v2, %v1155_v7  ;;  %v1925_v3 = vld [vmem:[#allocation7] ss:$0 sm:$0xff] }
 0x290   : > { %v1180_v12 = vadd.f32 %v1175_v2, %v1166_v9 }
 0x291   : > { %v1178_v13 = vadd.f32 %v1175_v2, %v1158_v10  ;;  %v1924_v2 = vld [vmem:[#allocation5] ss:$0 sm:$0xff] }
 0x292   : > { %v1199_v14 = vpack.c.bf16 %v1180_v12, %v1179_v11 }
 0x293   : > { %v1198_v4 = vpack.c.bf16 %v1178_v13, %v1177_v6 }
 0x295   : > { %2028 = vmatprep.mubr.bf16.mxu1 %v1198_v4 }
 0x296   : > { %2029 = vmatmul.mubr.bf16.vlgmr.msra.gmra.mrb[0].mxu1 %v1199_v14 }
 0x369   : > { %v2030_v16 = vpop.f32.mrb[0].mxu1 }
 0x36a   : > { %v1288_v17 = vpop.f32.mrb[1].mxu1  ;;  %v1297_v23 = vadd.f32 %v2030_v16, %v1915_v15 }
 0x36b   : > { %v1289_v18 = vadd.f32 %v1915_v15, %v1288_v17  ;;  %v2031_v19 = vpop.f32.mrb[2].mxu1 }
 0x36c   : > { %v1291_v22 = vpop.f32.mrb[3].mxu1  ;;  %v1300_v27 = vadd.f32 %v2031_v19, %v1915_v15  ;;  %v1305_v29 = vmax.f32 %v1297_v23, 0.0 }
 0x36d   : > { %v1303_v25 = vmax.f32 %v1289_v18, 0.0  ;;  %v1292_v26 = vadd.f32 %v1915_v15, %v1291_v22  ;;  %v1926_v22 = vld [vmem:[%s3149_s10] ss:$0 sm:$0xff] }
 0x36e   : > { %v1306_v30 = vmax.f32 %v1300_v27, 0.0 }
 0x36f   : > { %v1304_v28 = vmax.f32 %v1292_v26, 0.0  ;;  %1309 = vadd.xlane.f32.xlu0 %v1303_v25 }
 0x371   : > { %1311 = vadd.xlane.f32.xlu1 %v1304_v28 }
 0x373   : > { %1313 = vadd.xlane.f32.xlu0 %v1305_v29 }
 0x375   : > { %1315 = vadd.xlane.f32.xlu1 %v1306_v30 }
 0x3fc   : > { %v1310_v32 = vpop.xlane.xlu0 %1309 }
 0x3fd   : > { %v1318_v33 = vmul.f32 0.0078125, %v1310_v32 }
 0x3fe   : > { %v1312_v34 = vpop.xlane.xlu1 %1311 }
 0x3ff   : > { %v1322_v35 = vsub.f32 %v1303_v25, %v1318_v33  ;;  %v1319_v36 = vmul.f32 0.0078125, %v1312_v34 }
 0x400   : > { %v1314_v37 = vpop.xlane.xlu0 %1313 }
 0x401   : > { %v1323_v38 = vsub.f32 %v1304_v28, %v1319_v36  ;;  %v1320_v39 = vmul.f32 0.0078125, %v1314_v37  ;;  %v1326_v40 = vmul.f32 %v1322_v35, %v1322_v35  ;;  %v2230_v36 = vld [vmem:[#allocation8] sm:$0xff]  }
 0x402   : > { %v1316_v41 = vpop.xlane.xlu1 %1315  ;;  %2052 = vmatprep.subr.bf16.mxu1 %v2230_v36 }
 0x403   : > { %v1324_v42 = vsub.f32 %v1305_v29, %v1320_v39  ;;  %v1321_v43 = vmul.f32 0.0078125, %v1316_v41  ;;  %1330 = vadd.xlane.f32.xlu0 %v1326_v40  ;;  %v1327_v44 = vmul.f32 %v1323_v38, %v1323_v38  ;;  %2053 = vmatpush3.bf16.msra.mxu1 %v2230_v36 }
 0x404   : > { %2054 = vmatprep.subr.bf16.mxu1 %v2231_v53 }
 0x405   : > { %v1325_v45 = vsub.f32 %v1306_v30, %v1321_v43  ;;  %1332 = vadd.xlane.f32.xlu1 %v1327_v44  ;;  %v1328_v46 = vmul.f32 %v1324_v42, %v1324_v42 }
 0x407   : > { %1334 = vadd.xlane.f32.xlu0 %v1328_v46  ;;  %v1329_v47 = vmul.f32 %v1325_v45, %v1325_v45  ;;  %2055 = vmatpush3.bf16.msra.mxu1 %v2231_v53 }
 0x408   : > { %2056 = vmatprep.subr.bf16.mxu1 %v2232_v21 }
 0x409   : > { %1336 = vadd.xlane.f32.xlu1 %v1329_v47 }
 0x40b   : > { %2057 = vmatpush3.bf16.msra.mxu1 %v2232_v21 }
 0x490   : > { %v1331_v54 = vpop.xlane.xlu0 %1330 }
 0x491   : > { %v1338_v24 = vmul.f32 0.0078125, %v1331_v54  ;;  %v2233_v54 = vld [vmem:[#allocation8 + $0x18] sm:$0xff]  }
 0x492   : > { %v1333_v55 = vpop.xlane.xlu1 %1332  ;;  %2058 = vmatprep.subr.bf16.mxu1 %v2233_v54 }
 0x493   : > { %v1342_v56 = vadd.f32 1e-05, %v1338_v24  ;;  %v1339_v57 = vmul.f32 0.0078125, %v1333_v55  ;;  %2059 = vmatpush3.bf16.msra.mxu1 %v2233_v54  ;;  %v2234_v24 = vld [vmem:[#allocation8 + $0x20] sm:$0xff]   ;;  %v2235_v55 = vld [vmem:[#allocation8 + $0x28] sm:$0xff]  }
 0x494   : > { %v1335_v58 = vpop.xlane.xlu0 %1334  ;;  %2060 = vmatprep.subr.bf16.mxu1 %v2234_v24 }
 0x495   : > { %2238 = vrsqrt.f32 %v1342_v56  ;;  %v1343_v59 = vadd.f32 1e-05, %v1339_v57  ;;  %v1340_v60 = vmul.f32 0.0078125, %v1335_v58  ;;  %v2236_v56 = vld [vmem:[#allocation8 + $0x30] sm:$0xff]   ;;  %v2237_v57 = vld [vmem:[#allocation8 + $0x38] sm:$0xff]  }
 0x496   : > { %v1337_v61 = vpop.xlane.xlu1 %1336 }
 0x497   : > { %2240 = vrsqrt.f32 %v1343_v59  ;;  %v1344_v62 = vadd.f32 1e-05, %v1340_v60  ;;  %v1341_v63 = vmul.f32 0.0078125, %v1337_v61  ;;  %2061 = vmatpush3.bf16.msra.mxu1 %v2234_v24 }
 0x498   : > { %2062 = vmatprep.subr.bf16.mxu1 %v2235_v55 }
 0x499   : > { %2242 = vrsqrt.f32 %v1344_v62  ;;  %v1345_v0 = vadd.f32 1e-05, %v1341_v63 }
 0x49b   : > { %2244 = vrsqrt.f32 %v1345_v0  ;;  %2063 = vmatpush3.bf16.msra.mxu1 %v2235_v55 }
 0x49c   : > { %2064 = vmatprep.subr.bf16.mxu1 %v2236_v56 }
 0x49f   : > { %v2239_v1 = vpop.eup %2238  ;;  %2065 = vmatpush3.bf16.msra.mxu1 %v2236_v56 }
 0x4a0   : > { %v1350_v5 = vmul.f32 %v2239_v1, %v1322_v35  ;;  %2066 = vmatprep.subr.bf16.mxu1 %v2237_v57 }
 0x4a1   : > { %v2241_v20 = vpop.eup %2240 }
 0x4a2   : > { %v1351_v7 = vmul.f32 %v2241_v20, %v1323_v38  ;;  %v1360_v8 = vmul.f32 %v1924_v2, %v1350_v5 }
 0x4a3   : > { %v2243_v9 = vpop.eup %2242  ;;  %2067 = vmatpush3.bf16.msra.mxu1 %v2237_v57 }
 0x4a4   : > { %v1352_v10 = vmul.f32 %v2243_v9, %v1324_v42  ;;  %v1361_v11 = vmul.f32 %v1924_v2, %v1351_v7  ;;  %v3061_v13 = vadd.f32 %v1925_v3, %v1360_v8  ;;  %v1935_v9 = vld [vmem:[%s3150_s11] ss:$0 sm:$0xff] }
 0x4a5   : > { %v2245_v12 = vpop.eup %2244 }
 0x4a6   : > { %v1353_v6 = vmul.f32 %v2245_v12, %v1325_v45  ;;  %v3063_v14 = vadd.f32 %v1925_v3, %v1361_v11  ;;  %v1362_v4 = vmul.f32 %v1924_v2, %v1352_v10  ;;  %v1936_v11 = vld [vmem:[%s3151_s12] ss:$0 sm:$0xff] }
 0x4a8   : > { %v1391_v15 = vpack.c.bf16 %v3063_v14, %v3061_v13  ;;  %v1363_v16 = vmul.f32 %v1924_v2, %v1353_v6  ;;  %v3067_v17 = vadd.f32 %v1925_v3, %v1362_v4 }
 0x4aa   : > { %2048 = vmatprep.mubr.bf16.mxu0 %v1391_v15  ;;  %v3069_v18 = vadd.f32 %v1925_v3, %v1363_v16 }
 0x4ac   : > { %v1392_v19 = vpack.c.bf16 %v3069_v18, %v3067_v17 }
 0x4ae   : > { %2049 = vmatmul.mubr.bf16.vlgmr.msra.gmra.mrb[4].mxu0 %v1392_v19 }
 0x581   : > { %v2050_v23 = vpop.f32.mrb[4].mxu0 }
 0x582   : > { %v1481_v25 = vpop.f32.mrb[5].mxu0  ;;  %v1490_v29 = vadd.f32 %v2050_v23, %v1926_v22 }
 0x583   : > { %v1482_v26 = vadd.f32 %v1926_v22, %v1481_v25  ;;  %v2051_v27 = vpop.f32.mrb[6].mxu0 }
 0x584   : > { %v1484_v28 = vpop.f32.mrb[7].mxu0  ;;  %v1493_v32 = vadd.f32 %v2051_v27, %v1926_v22  ;;  %v1498_v34 = vmax.f32 %v1490_v29, 0.0 }
 0x585   : > { %v1496_v30 = vmax.f32 %v1482_v26, 0.0  ;;  %v1485_v31 = vadd.f32 %v1926_v22, %v1484_v28 }
 0x586   : > { %v1499_v35 = vmax.f32 %v1493_v32, 0.0 }
 0x587   : > { %v1497_v33 = vmax.f32 %v1485_v31, 0.0  ;;  %1502 = vadd.xlane.f32.xlu0 %v1496_v30 }
 0x589   : > { %1504 = vadd.xlane.f32.xlu1 %v1497_v33 }
 0x58b   : > { %1506 = vadd.xlane.f32.xlu0 %v1498_v34 }
 0x58d   : > { %1508 = vadd.xlane.f32.xlu1 %v1499_v35 }
 0x614   : > { %v1503_v37 = vpop.xlane.xlu0 %1502 }
 0x615   : > { %v1510_v38 = vmul.f32 0.0078125, %v1503_v37 }
 0x616   : > { %v1505_v39 = vpop.xlane.xlu1 %1504 }
 0x617   : > { %v1514_v40 = vsub.f32 %v1496_v30, %v1510_v38  ;;  %v1511_v41 = vmul.f32 0.0078125, %v1505_v39 }
 0x618   : > { %v1507_v42 = vpop.xlane.xlu0 %1506 }
 0x619   : > { %v1515_v43 = vsub.f32 %v1497_v33, %v1511_v41  ;;  %v1512_v44 = vmul.f32 0.0078125, %v1507_v42  ;;  %v1518_v45 = vmul.f32 %v1514_v40, %v1514_v40 }
 0x61a   : > { %v1509_v46 = vpop.xlane.xlu1 %1508 }
 0x61b   : > { %v1516_v47 = vsub.f32 %v1498_v34, %v1512_v44  ;;  %v1513_v48 = vmul.f32 0.0078125, %v1509_v46  ;;  %1522 = vadd.xlane.f32.xlu0 %v1518_v45  ;;  %v1519_v49 = vmul.f32 %v1515_v43, %v1515_v43 }
 0x61d   : > { %v1517_v50 = vsub.f32 %v1499_v35, %v1513_v48  ;;  %1524 = vadd.xlane.f32.xlu1 %v1519_v49  ;;  %v1520_v51 = vmul.f32 %v1516_v47, %v1516_v47 }
 0x61f   : > { %1526 = vadd.xlane.f32.xlu0 %v1520_v51  ;;  %v1521_v52 = vmul.f32 %v1517_v50, %v1517_v50 }
 0x621   : > { %1528 = vadd.xlane.f32.xlu1 %v1521_v52 }
 0x6a8   : > { %v1523_v58 = vpop.xlane.xlu0 %1522 }
 0x6a9   : > { %v1530_v59 = vmul.f32 0.0078125, %v1523_v58 }
 0x6aa   : > { %v1525_v60 = vpop.xlane.xlu1 %1524 }
 0x6ab   : > { %v1534_v61 = vadd.f32 1e-05, %v1530_v59  ;;  %v1531_v62 = vmul.f32 0.0078125, %v1525_v60 }
 0x6ac   : > { %v1527_v63 = vpop.xlane.xlu0 %1526 }
 0x6ad   : > { %2246 = vrsqrt.f32 %v1534_v61  ;;  %v1535_v0 = vadd.f32 1e-05, %v1531_v62  ;;  %v1532_v1 = vmul.f32 0.0078125, %v1527_v63 }
 0x6ae   : > { %v1529_v2 = vpop.xlane.xlu1 %1528 }
 0x6af   : > { %2248 = vrsqrt.f32 %v1535_v0  ;;  %v1536_v5 = vadd.f32 1e-05, %v1532_v1  ;;  %v1533_v20 = vmul.f32 0.0078125, %v1529_v2 }
 0x6b1   : > { %2250 = vrsqrt.f32 %v1536_v5  ;;  %v1537_v7 = vadd.f32 1e-05, %v1533_v20 }
 0x6b3   : > { %2252 = vrsqrt.f32 %v1537_v7 }
 0x6b7   : > { %v2247_v8 = vpop.eup %2246 }
 0x6b8   : > { %v1542_v3 = vmul.f32 %v2247_v8, %v1514_v40 }
 0x6b9   : > { %v2249_v10 = vpop.eup %2248 }
 0x6ba   : > { %v1543_v12 = vmul.f32 %v2249_v10, %v1515_v43  ;;  %v1552_v6 = vmul.f32 %v1935_v9, %v1542_v3 }
 0x6bb   : > { %v2251_v4 = vpop.eup %2250 }
 0x6bc   : > { %v1544_v15 = vmul.f32 %v2251_v4, %v1516_v47  ;;  %v1553_v16 = vmul.f32 %v1935_v9, %v1543_v12  ;;  %v1562_v19 = vadd.f32 %v1936_v11, %v1552_v6 }
 0x6bd   : > { %v2253_v22 = vpop.eup %2252 }
 0x6be   : > { %v1545_v23 = vmul.f32 %v2253_v22, %v1517_v50  ;;  %v1563_v25 = vadd.f32 %v1936_v11, %v1553_v16  ;;  %v1554_v26 = vmul.f32 %v1935_v9, %v1544_v15  ;;  %v1566_v27 = vadd.f32 %v1562_v19, %v3061_v13  ;;  %v1937_v13 = vld [vmem:[%s3188_s21] ss:$0 sm:$0xff] }
 0x6c0   : > { %v1567_v28 = vadd.f32 %v1563_v25, %v3063_v14  ;;  %v1555_v29 = vmul.f32 %v1935_v9, %v1545_v23  ;;  %v1564_v30 = vadd.f32 %v1936_v11, %v1554_v26 }
 0x6c2   : > { %v1587_v31 = vpack.c.bf16 %v1567_v28, %v1566_v27  ;;  %v1565_v32 = vadd.f32 %v1936_v11, %v1555_v29  ;;  %v1568_v33 = vadd.f32 %v1564_v30, %v3067_v17 }
 0x6c4   : > { %2068 = vmatprep.mubr.bf16.mxu1 %v1587_v31  ;;  %v1569_v34 = vadd.f32 %v1565_v32, %v3069_v18 }
 0x6c6   : > { %v1588_v35 = vpack.c.bf16 %v1569_v34, %v1568_v33 }
 0x6c8   : > { %2069 = vmatmul.mubr.bf16.vlgmr.msra.gmra.mrb[4].mxu1 %v1588_v35 }
 0x79b   : > { %v2070_v36 = vpop.f32.mrb[4].mxu1 }
 0x79c   : > { %v1686_v14 = vadd.f32 %v2070_v36, %v1937_v13  ;;  %v1677_v37 = vpop.f32.mrb[5].mxu1 }
 0x79d   : > { %v1678_v38 = vadd.f32 %v1937_v13, %v1677_v37  ;;  %v2071_v39 = vpop.f32.mrb[6].mxu1 }
 0x79e   : > { %1694 = vst [vmem:[%s557_s29 + $0x10] sm:$0xff] %v1686_v14  ;;  %v1689_v17 = vadd.f32 %v2071_v39, %v1937_v13  ;;  %v1680_v18 = vpop.f32.mrb[7].mxu1 }
 0x79f   : > { %1692 = vst [vmem:[%s557_s29] sm:$0xff] %v1678_v38  ;;  %v1681_v40 = vadd.f32 %v1937_v13, %v1680_v18 }
 0x7a0   : > { %1695 = vst [vmem:[%s557_s29 + $0x18] sm:$0xff] %v1689_v17 }
 0x7a1   : > { %1693 = vst [vmem:[%s557_s29 + $0x8] sm:$0xff] %v1681_v40 }
 0x7a2   : > { %2379 = shalt.err (!%p2376_p1)
}
 0x7a3   : > { %s2380_s25 = scalar_lea.hbm %s3096_s24, 512  ;;  %s2384_s29 = scalar_lea.hbm %s3190_s27, 1024 }
 0x7a4   : > { %p2381_p0 = scmp.ne.s32.totalorder %s3096_s24, %s2380_s25  ;;  %p2385_p9 = scmp.lt.u32.totalorder %s3096_s24, %s3190_s27 }
 0x7a5   : > { %p2386_p12 = scmp.lt.u32.totalorder %s2384_s29, %s2380_s25  ;;  %p2388_p2 = scmp.lt.u32.totalorder %s2380_s25, %s3096_s24 }
 0x7a6   : > { %p2382_p6 = pnand %p2381_p0, %p3191_p3 }
 0x7a7   : > { %p2387_p10 = por %p2386_p12, %p2385_p9 }
 0x7a8   : > { %p2383_p5 = pneg %p2382_p6 }
 0x7a9   : > { %p2389_p4 = por %p2388_p2, %p2387_p10 }
 0x7ab   : > { %p2390_p7 = pnand %p2389_p4, %p2383_p5 }
 0x7ad   : > { %2393 = shalt.err (!%p2390_p7)
}
 0x7ae   : > { %s2466_s15 = smov 128   ;;  %s2467_s18 = smov 8  }
 0x7af   : > { %2088 = dma.vmem_to_hbm [thread:$0]  (%p3191_p3), %s3091_s16, 512, %s3096_s24, %s3098_s22, %s2466_s15, %s2466_s15, %s2467_s18  }
 0x7b0 PF: > { %s3192_s17 = sld [smem:[#allocation17_spill]]  ;;  %s3193_s14 = sld [smem:[#allocation15_spill]] }
 0x7b1   : > { %s3194_s20 = sld [smem:[#allocation21_spill]] }
 0x7b6   : > { %p2115_p8 = scmp.ge.s32.totalorder %s3192_s17, 2  ;;  %s1725_s28 = sand.u32 1, %s3193_s14  }
 0x7b7   : > { %p3195_p11 = scmp.ne.s32.totalorder %s3194_s20, 0  ;;  %s1726_s25 = scalar_lea.sflag [#allocation4], %s1725_s28 }
 0x7b9   : > { %p2104_p13 = pnand %p2115_p8, %p3195_p11 }
 0x7bb   : > { %2423 = dma.done.wait (!%p2104_p13), %s1726_s25, 512  }
 0x7bc   : > { %2425 = vsyncadd (!%p2104_p13), %s1726_s25, 4294966784  ;;  %s3196_s21 = sld [smem:[#allocation18_spill]]  ;;  %s3197_s29 = sld [smem:[#allocation16_spill]] }
 0x7bd   : > { %s3198_s20 = sld [smem:[#allocation19_spill]]  ;;  %s3199_s18 = smov %s2432_s19 }
 0x7c2   : > { %p28_p1 = scmp.ge.s32.totalorder %s3196_s21, 4   ;;  %s3200_s19 = smov %s3197_s29 }
 0x7c4   :  { %30 = sbr.rel (!%p28_p1) target bundleno = 9 (0x9), region = 135 }
 0x7cb   :  { %1731 = vsyncpa [#allocation3], 1 }
 0x7cc   :  { %1733 = vsyncpa [#allocation3 + $0x1], 1 }
 0x7cd   :  { %1734 = vsyncpa [#allocation6], 1 }
 0x7ce   :  { %1735 = vsyncpa [#allocation9], 1 }
 0x7cf   :  { %1736 = vsyncpa [#allocation4], 1 }
 0x7d0   :  { %1738 = vsyncpa [#allocation4 + $0x1], 1 }

</bundles_post_ra>
